<compile_context>
chip_gen: v5e
topology: v5e:2x2
jax: 0.10.0
libtpu: 0.0.40
codegen_flags: <defaults>
</compile_context>

<pallas_src>
import functools

import jax
import jax.numpy as jnp
from jax import lax
from jax.experimental import pallas as pl
from jax.experimental.pallas import tpu as pltpu

LANE = 128


def _round_up(x, m):
    return (x + m - 1) // m * m


def _batch_tile(batch):
    # Prefer 128 (good MXU occupancy, keeps >=2 grid steps for megacore at
    # realistic batches, moderate VMEM), then other sublane-aligned divisors.
    for cand in (128, 256, 64, 32, 16, 8):
        if batch % cand == 0:
            return cand
    return batch


# ----------------------------- Pallas kernel --------------------------------

def fused_gru_fc_kernel(
        x_ref,        # (T, Bt, D)    bf16  time-major input block
        w_ih1_ref,    # (D, 3H)       bf16  layer-1 input weights (pre-transposed)
        gb1_ref,      # (1, 3H)       fp32  b_ih1 + [b_hr1, b_hz1, 0]
        w_hh1_ref,    # (H, 3H)       bf16
        b_hn1_ref,    # (1, H)        fp32
        w_ih2_ref,    # (H, 3H)       bf16
        gb2_ref,      # (1, 3H)       fp32  b_ih2 + [b_hr2, b_hz2, 0]
        w_hh2_ref,    # (H, 3H)       bf16
        b_hn2_ref,    # (1, H)        fp32
        fc_w_ref,     # (T, H, Npad)  bf16  fc weights split per timestep
        fc_b_ref,     # (1, Npad)     fp32
        out_ref,      # (Bt, Npad)    fp32
        gi1_buf,      # (T, Bt, 3H)   fp32  VMEM scratch: hoisted layer-1 input proj
        acc_ref,      # (Bt, Npad)    fp32  VMEM scratch: FC accumulator
):
    T, Bt, _ = x_ref.shape
    H = w_hh1_ref.shape[0]

    # ---- Phase 0: hoist the layer-1 input projection out of the recurrence.
    # These T matmuls have no serial dependency, so the unrolled loop lets the
    # MXU pipeline them back-to-back. Biases (b_ih1 and the r/z parts of b_hh1)
    # are pre-folded into gb1, so no per-step bias broadcast remains here.
    w_ih1 = w_ih1_ref[...]
    gb1 = gb1_ref[...]

    def proj_step(t, carry):
        gi1_buf[t] = jnp.dot(x_ref[t], w_ih1,
                             preferred_element_type=jnp.float32) + gb1
        return carry

    lax.fori_loop(0, T, proj_step, 0, unroll=True)

    # ---- Phase 1: fused recurrence for both GRU layers + FC accumulation.
    # Hoist all weight / bias loads out of the loop.
    w_hh1 = w_hh1_ref[...]
    b_hn1 = b_hn1_ref[...]
    w_ih2 = w_ih2_ref[...]
    gb2 = gb2_ref[...]
    w_hh2 = w_hh2_ref[...]
    b_hn2 = b_hn2_ref[...]

    acc_ref[...] = jnp.zeros_like(acc_ref)

    def step(t, carry):
        h1, h2 = carry

        # Layer 1: only the (Bt,H)x(H,3H) hidden matmul is on the serial path.
        gi1 = gi1_buf[t]
        gh1 = jnp.dot(h1.astype(jnp.bfloat16), w_hh1,
                      preferred_element_type=jnp.float32)
        rz1 = jax.nn.sigmoid(gi1[:, :2 * H] + gh1[:, :2 * H])
        r1, z1 = rz1[:, :H], rz1[:, H:]
        n1 = jnp.tanh(gi1[:, 2 * H:] + r1 * (gh1[:, 2 * H:] + b_hn1))
        h1 = (1.0 - z1) * n1 + z1 * h1

        # Layer 2: the input projection depends only on h1_t (not on h2_{t-1}),
        # so under full unrolling it overlaps with the layer-2 hidden matmul.
        h1_bf = h1.astype(jnp.bfloat16)
        gi2 = jnp.dot(h1_bf, w_ih2, preferred_element_type=jnp.float32) + gb2
        gh2 = jnp.dot(h2.astype(jnp.bfloat16), w_hh2,
                      preferred_element_type=jnp.float32)
        rz2 = jax.nn.sigmoid(gi2[:, :2 * H] + gh2[:, :2 * H])
        r2, z2 = rz2[:, :H], rz2[:, H:]
        n2 = jnp.tanh(gi2[:, 2 * H:] + r2 * (gh2[:, 2 * H:] + b_hn2))
        h2 = (1.0 - z2) * n2 + z2 * h2

        # Fused FC epilogue: out += h2_t @ W_fc[t]  (fp32, lane-dense Npad cols).
        # Lives in VMEM scratch (off the h1/h2 critical path, no vreg pressure).
        acc_ref[...] += jnp.dot(h2.astype(jnp.bfloat16), fc_w_ref[t],
                                preferred_element_type=jnp.float32)
        return (h1, h2)

    h0 = jnp.zeros((Bt, H), jnp.float32)   # h0 = zeros (matches the module)
    lax.fori_loop(0, T, step, (h0, h0), unroll=True)

    out_ref[...] = (acc_ref[...] + fc_b_ref[...]).astype(out_ref.dtype)


# ------------------------------- wrappers ------------------------------------

def prepare_params(params, seq_len, num_classes):
    """One-time prep (outside the forward): transpose + bf16-cast weights,
    fold biases, reshape & lane-pad the FC weights to (T, H, Npad)."""
    assert len(params["gru"]) == 2, "kernel is specialized for num_layers=2"
    H = params["gru"][0]["w_hh"].shape[1]
    kp = {}
    for li, lp in enumerate(params["gru"], start=1):
        b_ih, b_hh = lp["b_ih"], lp["b_hh"]
        folded = b_ih + jnp.concatenate(
            [b_hh[0:H], b_hh[H:2 * H], jnp.zeros((H,), b_hh.dtype)])
        kp[f"w_ih{li}"] = lp["w_ih"].T.astype(jnp.bfloat16)            # (D_in, 3H)
        kp[f"w_hh{li}"] = lp["w_hh"].T.astype(jnp.bfloat16)            # (H, 3H)
        kp[f"gb{li}"] = folded[None, :].astype(jnp.float32)            # (1, 3H)
        kp[f"b_hn{li}"] = b_hh[2 * H:][None, :].astype(jnp.float32)    # (1, H)

    n_pad = _round_up(num_classes, LANE)
    fc_w = params["fc_w"]                                              # (N, T*H)
    fc_w3 = fc_w.reshape(num_classes, seq_len, H).transpose(1, 2, 0)   # (T, H, N)
    fc_w3 = jnp.pad(fc_w3, ((0, 0), (0, 0), (0, n_pad - num_classes)))
    kp["fc_w"] = fc_w3.astype(jnp.bfloat16)                            # (T, H, Npad)
    fc_b = jnp.pad(params["fc_b"], (0, n_pad - num_classes))
    kp["fc_b"] = fc_b[None, :].astype(jnp.float32)                     # (1, Npad)
    return kp


@functools.partial(jax.jit, static_argnums=(2,))
def rnn_forward(x, kp, num_classes):
    """Equivalent of RNN.forward. x: (B, T, D_in) batch-first."""
    B, T, D = x.shape
    H = kp["w_hh1"].shape[0]
    n_pad = kp["fc_b"].shape[1]
    bt = _batch_tile(B)
    assert B % bt == 0

    # Time-major + bf16: halves the x DMA and removes per-step casts in-kernel
    # (matmuls run in bf16 regardless).
    x_tm = jnp.transpose(x, (1, 0, 2)).astype(jnp.bfloat16)

    out = pl.pallas_call(
        fused_gru_fc_kernel,
        grid=(B // bt,),
        in_specs=[
            pl.BlockSpec((T, bt, D), lambda b: (0, b, 0)),       # x (batch-tiled)
            pl.BlockSpec((D, 3 * H), lambda b: (0, 0)),          # w_ih1
            pl.BlockSpec((1, 3 * H), lambda b: (0, 0)),          # gb1
            pl.BlockSpec((H, 3 * H), lambda b: (0, 0)),          # w_hh1
            pl.BlockSpec((1, H), lambda b: (0, 0)),              # b_hn1
            pl.BlockSpec((H, 3 * H), lambda b: (0, 0)),          # w_ih2
            pl.BlockSpec((1, 3 * H), lambda b: (0, 0)),          # gb2
            pl.BlockSpec((H, 3 * H), lambda b: (0, 0)),          # w_hh2
            pl.BlockSpec((1, H), lambda b: (0, 0)),              # b_hn2
            pl.BlockSpec((T, H, n_pad), lambda b: (0, 0, 0)),    # fc_w
            pl.BlockSpec((1, n_pad), lambda b: (0, 0)),          # fc_b
        ],
        out_specs=pl.BlockSpec((bt, n_pad), lambda b: (b, 0)),
        out_shape=jax.ShapeDtypeStruct((B, n_pad), jnp.float32),
        scratch_shapes=[pltpu.VMEM((T, bt, 3 * H), jnp.float32),
                        pltpu.VMEM((bt, n_pad), jnp.float32)],
        compiler_params=pltpu.CompilerParams(
            dimension_semantics=("parallel",),
            vmem_limit_bytes=48 * 1024 * 1024),
    )(x_tm, kp["w_ih1"], kp["gb1"], kp["w_hh1"], kp["b_hn1"],
      kp["w_ih2"], kp["gb2"], kp["w_hh2"], kp["b_hn2"],
      kp["fc_w"], kp["fc_b"])

    return out[:, :num_classes]


# --------------------------- pure-JAX reference -------------------------------

def gru_ref(x, params):
    """fp32 reference matching torch.nn.GRU(batch_first) + Linear semantics."""
    h = x
    for lp in params["gru"]:
        H = lp["w_hh"].shape[1]
        w_ih_t, w_hh_t = lp["w_ih"].T, lp["w_hh"].T
        b_ih, b_hh = lp["b_ih"], lp["b_hh"]

        def step(h_prev, x_t):
            gi = jnp.dot(x_t, w_ih_t, precision=lax.Precision.HIGHEST) + b_ih
            gh = jnp.dot(h_prev, w_hh_t, precision=lax.Precision.HIGHEST) + b_hh
            r = jax.nn.sigmoid(gi[:, :H] + gh[:, :H])
            z = jax.nn.sigmoid(gi[:, H:2 * H] + gh[:, H:2 * H])
            n = jnp.tanh(gi[:, 2 * H:] + r * gh[:, 2 * H:])
            h_new = (1.0 - z) * n + z * h_prev
            return h_new, h_new

        h0 = jnp.zeros((h.shape[0], H), jnp.float32)
        _, outs = lax.scan(step, h0, jnp.transpose(h, (1, 0, 2)))
        h = jnp.transpose(outs, (1, 0, 2))
    flat = h.reshape(h.shape[0], -1)
    return (jnp.dot(flat, params["fc_w"].T, precision=lax.Precision.HIGHEST)
            + params["fc_b"])


# ---------------------------------- main --------------------------------------

def make_params(key, input_size, hidden_size, num_layers, num_classes, seq_len):
    params = {"gru": []}
    scale = 1.0 / jnp.sqrt(hidden_size)
    for layer in range(num_layers):
        d_in = input_size if layer == 0 else hidden_size
        key, k1, k2, k3, k4 = jax.random.split(key, 5)
        params["gru"].append({
            "w_ih": jax.random.uniform(k1, (3 * hidden_size, d_in), jnp.float32, -scale, scale),
            "w_hh": jax.random.uniform(k2, (3 * hidden_size, hidden_size), jnp.float32, -scale, scale),
            "b_ih": jax.random.uniform(k3, (3 * hidden_size,), jnp.float32, -scale, scale),
            "b_hh": jax.random.uniform(k4, (3 * hidden_size,), jnp.float32, -scale, scale),
        })
    key, k1, k2 = jax.random.split(key, 3)
    fc_in = hidden_size * seq_len
    fscale = 1.0 / jnp.sqrt(fc_in)
    params["fc_w"] = jax.random.uniform(k1, (num_classes, fc_in), jnp.float32, -fscale, fscale)
    params["fc_b"] = jax.random.uniform(k2, (num_classes,), jnp.float32, -fscale, fscale)
    return params


if __name__ == "__main__":
    # Small shapes consistent with the module (module: input=28, hidden=256,
    # layers=2, classes=10, seq=28). Batch chosen as a multiple of 8 for
    # sublane-aligned batch tiles.
    batch, seq_len, input_size = 8, 8, 28
    hidden_size, num_layers, num_classes = 32, 2, 10

    key = jax.random.PRNGKey(0)
    key, kx, kpk = jax.random.split(key, 3)
    x = jax.random.normal(kx, (batch, seq_len, input_size), jnp.float32)
    params = make_params(kpk, input_size, hidden_size, num_layers,
                         num_classes, seq_len)

    # Round inputs/weights through bf16 once so the fp32 reference shares the
    # kernel's quantized operands (the kernel runs its matmuls in bf16).
    bf16_round = lambda t: t.astype(jnp.bfloat16).astype(jnp.float32)
    x = bf16_round(x)
    params = jax.tree_util.tree_map(bf16_round, params)

    kparams = prepare_params(params, seq_len, num_classes)

    out = rnn_forward(x, kparams, num_classes)
    out = jax.block_until_ready(out)

    ref = gru_ref(x, params)
    assert out.shape == (batch, num_classes), out.shape
    max_err = float(jnp.max(jnp.abs(out - ref)))
    assert jnp.allclose(out, ref, atol=3e-2, rtol=3e-2), f"max abs err {max_err}"

    print("KERNEL_OK")
</pallas_src>

<mosaic_0001>
module attributes {stable_mosaic.version = 11 : i64} {
  func.func @fused_gru_fc_kernel(%arg0: i32, %arg1: memref<8x8x28xbf16, #tpu.memory_space<vmem>>, %arg2: memref<28x96xbf16, #tpu.memory_space<vmem>>, %arg3: memref<1x96xf32, #tpu.memory_space<vmem>>, %arg4: memref<32x96xbf16, #tpu.memory_space<vmem>>, %arg5: memref<1x32xf32, #tpu.memory_space<vmem>>, %arg6: memref<32x96xbf16, #tpu.memory_space<vmem>>, %arg7: memref<1x96xf32, #tpu.memory_space<vmem>>, %arg8: memref<32x96xbf16, #tpu.memory_space<vmem>>, %arg9: memref<1x32xf32, #tpu.memory_space<vmem>>, %arg10: memref<8x32x128xbf16, #tpu.memory_space<vmem>>, %arg11: memref<1x128xf32, #tpu.memory_space<vmem>>, %arg12: memref<8x128xf32, #tpu.memory_space<vmem>>, %arg13: memref<8x8x96xf32, #tpu.memory_space<vmem>>, %arg14: memref<8x128xf32, #tpu.memory_space<vmem>>) attributes {dimension_semantics = [#tpu.dimension_semantics<parallel>], iteration_bounds = array<i64: 1>, scalar_prefetch = 0 : i64, scratch_operands = 2 : i64, tpu.core_type = #tpu.core_type<tc>, window_params = [{transform_indices = @transform_0, window_bounds = array<i64: 8, 8, 28>}, {pipeline_mode = #tpu.pipeline_mode<synchronous>, transform_indices = @transform_1, window_bounds = array<i64: 28, 96>}, {pipeline_mode = #tpu.pipeline_mode<synchronous>, transform_indices = @transform_2, window_bounds = array<i64: 1, 96>}, {pipeline_mode = #tpu.pipeline_mode<synchronous>, transform_indices = @transform_3, window_bounds = array<i64: 32, 96>}, {pipeline_mode = #tpu.pipeline_mode<synchronous>, transform_indices = @transform_4, window_bounds = array<i64: 1, 32>}, {pipeline_mode = #tpu.pipeline_mode<synchronous>, transform_indices = @transform_5, window_bounds = array<i64: 32, 96>}, {pipeline_mode = #tpu.pipeline_mode<synchronous>, transform_indices = @transform_6, window_bounds = array<i64: 1, 96>}, {pipeline_mode = #tpu.pipeline_mode<synchronous>, transform_indices = @transform_7, window_bounds = array<i64: 32, 96>}, {pipeline_mode = #tpu.pipeline_mode<synchronous>, transform_indices = @transform_8, window_bounds = array<i64: 1, 32>}, {pipeline_mode = #tpu.pipeline_mode<synchronous>, transform_indices = @transform_9, window_bounds = array<i64: 8, 32, 128>}, {pipeline_mode = #tpu.pipeline_mode<synchronous>, transform_indices = @transform_10, window_bounds = array<i64: 1, 128>}, {transform_indices = @transform_11, window_bounds = array<i64: 8, 128>}]} {
    %c0 = arith.constant 0 : index
    %c0_0 = arith.constant 0 : index
    %0 = vector.load %arg2[%c0, %c0_0] : memref<28x96xbf16, #tpu.memory_space<vmem>>, vector<28x96xbf16>
    %c0_1 = arith.constant 0 : index
    %c0_2 = arith.constant 0 : index
    %1 = vector.load %arg3[%c0_1, %c0_2] : memref<1x96xf32, #tpu.memory_space<vmem>>, vector<1x96xf32>
    %c0_i32 = arith.constant 0 : i32
    %2 = arith.index_cast %c0_i32 : i32 to index
    %c0_3 = arith.constant 0 : index
    %c0_4 = arith.constant 0 : index
    %3 = vector.load %arg1[%2, %c0_3, %c0_4] : memref<8x8x28xbf16, #tpu.memory_space<vmem>>, vector<1x8x28xbf16>
    %4 = vector.shape_cast %3 : vector<1x8x28xbf16> to vector<8x28xbf16>
    %cst = arith.constant dense<0.000000e+00> : vector<8x96xf32>
    %5 = tpu.matmul %4, %0, %cst {dimension_numbers = #tpu.dot_dimension_numbers<[1], [0], [0], [1], [0, 0, 1, 1], [], []>} : vector<8x28xbf16>, vector<28x96xbf16>, vector<8x96xf32> -> vector<8x96xf32>
    %6 = vector.broadcast %1 : vector<1x96xf32> to vector<8x96xf32>
    %7 = arith.addf %5, %6 : vector<8x96xf32>
    %8 = arith.index_cast %c0_i32 : i32 to index
    %c0_5 = arith.constant 0 : index
    %c0_6 = arith.constant 0 : index
    %9 = vector.load %arg13[%8, %c0_5, %c0_6] : memref<8x8x96xf32, #tpu.memory_space<vmem>>, vector<1x8x96xf32>
    %10 = vector.shape_cast %9 : vector<1x8x96xf32> to vector<8x96xf32>
    %11 = vector.shape_cast %7 : vector<8x96xf32> to vector<1x8x96xf32>
    tpu.vector_store %arg13[%8, %c0_5, %c0_6], %11 {strides = array<i32>} : memref<8x8x96xf32, #tpu.memory_space<vmem>>, vector<1x8x96xf32>,
    %c1_i32 = arith.constant 1 : i32
    %12 = arith.index_cast %c1_i32 : i32 to index
    %c0_7 = arith.constant 0 : index
    %c0_8 = arith.constant 0 : index
    %13 = vector.load %arg1[%12, %c0_7, %c0_8] : memref<8x8x28xbf16, #tpu.memory_space<vmem>>, vector<1x8x28xbf16>
    %14 = vector.shape_cast %13 : vector<1x8x28xbf16> to vector<8x28xbf16>
    %cst_9 = arith.constant dense<0.000000e+00> : vector<8x96xf32>
    %15 = tpu.matmul %14, %0, %cst_9 {dimension_numbers = #tpu.dot_dimension_numbers<[1], [0], [0], [1], [0, 0, 1, 1], [], []>} : vector<8x28xbf16>, vector<28x96xbf16>, vector<8x96xf32> -> vector<8x96xf32>
    %16 = vector.broadcast %1 : vector<1x96xf32> to vector<8x96xf32>
    %17 = arith.addf %15, %16 : vector<8x96xf32>
    %18 = arith.index_cast %c1_i32 : i32 to index
    %c0_10 = arith.constant 0 : index
    %c0_11 = arith.constant 0 : index
    %19 = vector.load %arg13[%18, %c0_10, %c0_11] : memref<8x8x96xf32, #tpu.memory_space<vmem>>, vector<1x8x96xf32>
    %20 = vector.shape_cast %19 : vector<1x8x96xf32> to vector<8x96xf32>
    %21 = vector.shape_cast %17 : vector<8x96xf32> to vector<1x8x96xf32>
    tpu.vector_store %arg13[%18, %c0_10, %c0_11], %21 {strides = array<i32>} : memref<8x8x96xf32, #tpu.memory_space<vmem>>, vector<1x8x96xf32>,
    %c2_i32 = arith.constant 2 : i32
    %22 = arith.index_cast %c2_i32 : i32 to index
    %c0_12 = arith.constant 0 : index
    %c0_13 = arith.constant 0 : index
    %23 = vector.load %arg1[%22, %c0_12, %c0_13] : memref<8x8x28xbf16, #tpu.memory_space<vmem>>, vector<1x8x28xbf16>
    %24 = vector.shape_cast %23 : vector<1x8x28xbf16> to vector<8x28xbf16>
    %cst_14 = arith.constant dense<0.000000e+00> : vector<8x96xf32>
    %25 = tpu.matmul %24, %0, %cst_14 {dimension_numbers = #tpu.dot_dimension_numbers<[1], [0], [0], [1], [0, 0, 1, 1], [], []>} : vector<8x28xbf16>, vector<28x96xbf16>, vector<8x96xf32> -> vector<8x96xf32>
    %26 = vector.broadcast %1 : vector<1x96xf32> to vector<8x96xf32>
    %27 = arith.addf %25, %26 : vector<8x96xf32>
    %28 = arith.index_cast %c2_i32 : i32 to index
    %c0_15 = arith.constant 0 : index
    %c0_16 = arith.constant 0 : index
    %29 = vector.load %arg13[%28, %c0_15, %c0_16] : memref<8x8x96xf32, #tpu.memory_space<vmem>>, vector<1x8x96xf32>
    %30 = vector.shape_cast %29 : vector<1x8x96xf32> to vector<8x96xf32>
    %31 = vector.shape_cast %27 : vector<8x96xf32> to vector<1x8x96xf32>
    tpu.vector_store %arg13[%28, %c0_15, %c0_16], %31 {strides = array<i32>} : memref<8x8x96xf32, #tpu.memory_space<vmem>>, vector<1x8x96xf32>,
    %c3_i32 = arith.constant 3 : i32
    %32 = arith.index_cast %c3_i32 : i32 to index
    %c0_17 = arith.constant 0 : index
    %c0_18 = arith.constant 0 : index
    %33 = vector.load %arg1[%32, %c0_17, %c0_18] : memref<8x8x28xbf16, #tpu.memory_space<vmem>>, vector<1x8x28xbf16>
    %34 = vector.shape_cast %33 : vector<1x8x28xbf16> to vector<8x28xbf16>
    %cst_19 = arith.constant dense<0.000000e+00> : vector<8x96xf32>
    %35 = tpu.matmul %34, %0, %cst_19 {dimension_numbers = #tpu.dot_dimension_numbers<[1], [0], [0], [1], [0, 0, 1, 1], [], []>} : vector<8x28xbf16>, vector<28x96xbf16>, vector<8x96xf32> -> vector<8x96xf32>
    %36 = vector.broadcast %1 : vector<1x96xf32> to vector<8x96xf32>
    %37 = arith.addf %35, %36 : vector<8x96xf32>
    %38 = arith.index_cast %c3_i32 : i32 to index
    %c0_20 = arith.constant 0 : index
    %c0_21 = arith.constant 0 : index
    %39 = vector.load %arg13[%38, %c0_20, %c0_21] : memref<8x8x96xf32, #tpu.memory_space<vmem>>, vector<1x8x96xf32>
    %40 = vector.shape_cast %39 : vector<1x8x96xf32> to vector<8x96xf32>
    %41 = vector.shape_cast %37 : vector<8x96xf32> to vector<1x8x96xf32>
    tpu.vector_store %arg13[%38, %c0_20, %c0_21], %41 {strides = array<i32>} : memref<8x8x96xf32, #tpu.memory_space<vmem>>, vector<1x8x96xf32>,
    %c4_i32 = arith.constant 4 : i32
    %42 = arith.index_cast %c4_i32 : i32 to index
    %c0_22 = arith.constant 0 : index
    %c0_23 = arith.constant 0 : index
    %43 = vector.load %arg1[%42, %c0_22, %c0_23] : memref<8x8x28xbf16, #tpu.memory_space<vmem>>, vector<1x8x28xbf16>
    %44 = vector.shape_cast %43 : vector<1x8x28xbf16> to vector<8x28xbf16>
    %cst_24 = arith.constant dense<0.000000e+00> : vector<8x96xf32>
    %45 = tpu.matmul %44, %0, %cst_24 {dimension_numbers = #tpu.dot_dimension_numbers<[1], [0], [0], [1], [0, 0, 1, 1], [], []>} : vector<8x28xbf16>, vector<28x96xbf16>, vector<8x96xf32> -> vector<8x96xf32>
    %46 = vector.broadcast %1 : vector<1x96xf32> to vector<8x96xf32>
    %47 = arith.addf %45, %46 : vector<8x96xf32>
    %48 = arith.index_cast %c4_i32 : i32 to index
    %c0_25 = arith.constant 0 : index
    %c0_26 = arith.constant 0 : index
    %49 = vector.load %arg13[%48, %c0_25, %c0_26] : memref<8x8x96xf32, #tpu.memory_space<vmem>>, vector<1x8x96xf32>
    %50 = vector.shape_cast %49 : vector<1x8x96xf32> to vector<8x96xf32>
    %51 = vector.shape_cast %47 : vector<8x96xf32> to vector<1x8x96xf32>
    tpu.vector_store %arg13[%48, %c0_25, %c0_26], %51 {strides = array<i32>} : memref<8x8x96xf32, #tpu.memory_space<vmem>>, vector<1x8x96xf32>,
    %c5_i32 = arith.constant 5 : i32
    %52 = arith.index_cast %c5_i32 : i32 to index
    %c0_27 = arith.constant 0 : index
    %c0_28 = arith.constant 0 : index
    %53 = vector.load %arg1[%52, %c0_27, %c0_28] : memref<8x8x28xbf16, #tpu.memory_space<vmem>>, vector<1x8x28xbf16>
    %54 = vector.shape_cast %53 : vector<1x8x28xbf16> to vector<8x28xbf16>
    %cst_29 = arith.constant dense<0.000000e+00> : vector<8x96xf32>
    %55 = tpu.matmul %54, %0, %cst_29 {dimension_numbers = #tpu.dot_dimension_numbers<[1], [0], [0], [1], [0, 0, 1, 1], [], []>} : vector<8x28xbf16>, vector<28x96xbf16>, vector<8x96xf32> -> vector<8x96xf32>
    %56 = vector.broadcast %1 : vector<1x96xf32> to vector<8x96xf32>
    %57 = arith.addf %55, %56 : vector<8x96xf32>
    %58 = arith.index_cast %c5_i32 : i32 to index
    %c0_30 = arith.constant 0 : index
    %c0_31 = arith.constant 0 : index
    %59 = vector.load %arg13[%58, %c0_30, %c0_31] : memref<8x8x96xf32, #tpu.memory_space<vmem>>, vector<1x8x96xf32>
    %60 = vector.shape_cast %59 : vector<1x8x96xf32> to vector<8x96xf32>
    %61 = vector.shape_cast %57 : vector<8x96xf32> to vector<1x8x96xf32>
    tpu.vector_store %arg13[%58, %c0_30, %c0_31], %61 {strides = array<i32>} : memref<8x8x96xf32, #tpu.memory_space<vmem>>, vector<1x8x96xf32>,
    %c6_i32 = arith.constant 6 : i32
    %62 = arith.index_cast %c6_i32 : i32 to index
    %c0_32 = arith.constant 0 : index
    %c0_33 = arith.constant 0 : index
    %63 = vector.load %arg1[%62, %c0_32, %c0_33] : memref<8x8x28xbf16, #tpu.memory_space<vmem>>, vector<1x8x28xbf16>
    %64 = vector.shape_cast %63 : vector<1x8x28xbf16> to vector<8x28xbf16>
    %cst_34 = arith.constant dense<0.000000e+00> : vector<8x96xf32>
    %65 = tpu.matmul %64, %0, %cst_34 {dimension_numbers = #tpu.dot_dimension_numbers<[1], [0], [0], [1], [0, 0, 1, 1], [], []>} : vector<8x28xbf16>, vector<28x96xbf16>, vector<8x96xf32> -> vector<8x96xf32>
    %66 = vector.broadcast %1 : vector<1x96xf32> to vector<8x96xf32>
    %67 = arith.addf %65, %66 : vector<8x96xf32>
    %68 = arith.index_cast %c6_i32 : i32 to index
    %c0_35 = arith.constant 0 : index
    %c0_36 = arith.constant 0 : index
    %69 = vector.load %arg13[%68, %c0_35, %c0_36] : memref<8x8x96xf32, #tpu.memory_space<vmem>>, vector<1x8x96xf32>
    %70 = vector.shape_cast %69 : vector<1x8x96xf32> to vector<8x96xf32>
    %71 = vector.shape_cast %67 : vector<8x96xf32> to vector<1x8x96xf32>
    tpu.vector_store %arg13[%68, %c0_35, %c0_36], %71 {strides = array<i32>} : memref<8x8x96xf32, #tpu.memory_space<vmem>>, vector<1x8x96xf32>,
    %c7_i32 = arith.constant 7 : i32
    %72 = arith.index_cast %c7_i32 : i32 to index
    %c0_37 = arith.constant 0 : index
    %c0_38 = arith.constant 0 : index
    %73 = vector.load %arg1[%72, %c0_37, %c0_38] : memref<8x8x28xbf16, #tpu.memory_space<vmem>>, vector<1x8x28xbf16>
    %74 = vector.shape_cast %73 : vector<1x8x28xbf16> to vector<8x28xbf16>
    %cst_39 = arith.constant dense<0.000000e+00> : vector<8x96xf32>
    %75 = tpu.matmul %74, %0, %cst_39 {dimension_numbers = #tpu.dot_dimension_numbers<[1], [0], [0], [1], [0, 0, 1, 1], [], []>} : vector<8x28xbf16>, vector<28x96xbf16>, vector<8x96xf32> -> vector<8x96xf32>
    %76 = vector.broadcast %1 : vector<1x96xf32> to vector<8x96xf32>
    %77 = arith.addf %75, %76 : vector<8x96xf32>
    %78 = arith.index_cast %c7_i32 : i32 to index
    %c0_40 = arith.constant 0 : index
    %c0_41 = arith.constant 0 : index
    %79 = vector.load %arg13[%78, %c0_40, %c0_41] : memref<8x8x96xf32, #tpu.memory_space<vmem>>, vector<1x8x96xf32>
    %80 = vector.shape_cast %79 : vector<1x8x96xf32> to vector<8x96xf32>
    %81 = vector.shape_cast %77 : vector<8x96xf32> to vector<1x8x96xf32>
    tpu.vector_store %arg13[%78, %c0_40, %c0_41], %81 {strides = array<i32>} : memref<8x8x96xf32, #tpu.memory_space<vmem>>, vector<1x8x96xf32>,
    %c8_i32 = arith.constant 8 : i32
    %c0_42 = arith.constant 0 : index
    %c0_43 = arith.constant 0 : index
    %82 = vector.load %arg4[%c0_42, %c0_43] : memref<32x96xbf16, #tpu.memory_space<vmem>>, vector<32x96xbf16>
    %c0_44 = arith.constant 0 : index
    %c0_45 = arith.constant 0 : index
    %83 = vector.load %arg5[%c0_44, %c0_45] : memref<1x32xf32, #tpu.memory_space<vmem>>, vector<1x32xf32>
    %c0_46 = arith.constant 0 : index
    %c0_47 = arith.constant 0 : index
    %84 = vector.load %arg6[%c0_46, %c0_47] : memref<32x96xbf16, #tpu.memory_space<vmem>>, vector<32x96xbf16>
    %c0_48 = arith.constant 0 : index
    %c0_49 = arith.constant 0 : index
    %85 = vector.load %arg7[%c0_48, %c0_49] : memref<1x96xf32, #tpu.memory_space<vmem>>, vector<1x96xf32>
    %c0_50 = arith.constant 0 : index
    %c0_51 = arith.constant 0 : index
    %86 = vector.load %arg8[%c0_50, %c0_51] : memref<32x96xbf16, #tpu.memory_space<vmem>>, vector<32x96xbf16>
    %c0_52 = arith.constant 0 : index
    %c0_53 = arith.constant 0 : index
    %87 = vector.load %arg9[%c0_52, %c0_53] : memref<1x32xf32, #tpu.memory_space<vmem>>, vector<1x32xf32>
    %cst_54 = arith.constant 0.000000e+00 : f32
    %88 = vector.broadcast %cst_54 : f32 to vector<8x128xf32>
    %c0_55 = arith.constant 0 : index
    %c0_56 = arith.constant 0 : index
    %89 = vector.load %arg14[%c0_55, %c0_56] : memref<8x128xf32, #tpu.memory_space<vmem>>, vector<8x128xf32>
    tpu.vector_store %arg14[%c0_55, %c0_56], %88 {strides = array<i32>} : memref<8x128xf32, #tpu.memory_space<vmem>>, vector<8x128xf32>,
    %cst_57 = arith.constant 0.000000e+00 : f32
    %90 = vector.broadcast %cst_57 : f32 to vector<8x32xf32>
    %c0_i32_58 = arith.constant 0 : i32
    %91 = arith.index_cast %c0_i32_58 : i32 to index
    %c0_59 = arith.constant 0 : index
    %c0_60 = arith.constant 0 : index
    %92 = vector.load %arg13[%91, %c0_59, %c0_60] : memref<8x8x96xf32, #tpu.memory_space<vmem>>, vector<1x8x96xf32>
    %93 = vector.shape_cast %92 : vector<1x8x96xf32> to vector<8x96xf32>
    %94 = arith.truncf %90 : vector<8x32xf32> to vector<8x32xbf16>
    %cst_61 = arith.constant dense<0.000000e+00> : vector<8x96xf32>
    %95 = tpu.matmul %94, %82, %cst_61 {dimension_numbers = #tpu.dot_dimension_numbers<[1], [0], [0], [1], [0, 0, 1, 1], [], []>} : vector<8x32xbf16>, vector<32x96xbf16>, vector<8x96xf32> -> vector<8x96xf32>
    %96 = vector.extract_strided_slice %93 {offsets = [0, 0], sizes = [8, 64], strides = [1, 1]} : vector<8x96xf32> to vector<8x64xf32>
    %97 = vector.extract_strided_slice %95 {offsets = [0, 0], sizes = [8, 64], strides = [1, 1]} : vector<8x96xf32> to vector<8x64xf32>
    %98 = arith.addf %96, %97 : vector<8x64xf32>
    %99 = arith.negf %98 : vector<8x64xf32>
    %100 = math.exp %99 : vector<8x64xf32>
    %cst_62 = arith.constant 1.000000e+00 : f32
    %101 = vector.broadcast %cst_62 : f32 to vector<8x64xf32>
    %102 = arith.addf %101, %100 : vector<8x64xf32>
    %103 = arith.divf %101, %102 : vector<8x64xf32>
    %104 = vector.extract_strided_slice %103 {offsets = [0, 0], sizes = [8, 32], strides = [1, 1]} : vector<8x64xf32> to vector<8x32xf32>
    %105 = vector.extract_strided_slice %103 {offsets = [0, 32], sizes = [8, 32], strides = [1, 1]} : vector<8x64xf32> to vector<8x32xf32>
    %106 = vector.extract_strided_slice %93 {offsets = [0, 64], sizes = [8, 32], strides = [1, 1]} : vector<8x96xf32> to vector<8x32xf32>
    %107 = vector.extract_strided_slice %95 {offsets = [0, 64], sizes = [8, 32], strides = [1, 1]} : vector<8x96xf32> to vector<8x32xf32>
    %108 = vector.broadcast %83 : vector<1x32xf32> to vector<8x32xf32>
    %109 = arith.addf %107, %108 : vector<8x32xf32>
    %110 = arith.mulf %104, %109 : vector<8x32xf32>
    %111 = arith.addf %106, %110 : vector<8x32xf32>
    %112 = math.tanh %111 : vector<8x32xf32>
    %cst_63 = arith.constant 1.000000e+00 : f32
    %113 = vector.broadcast %cst_63 : f32 to vector<8x32xf32>
    %114 = arith.subf %113, %105 : vector<8x32xf32>
    %115 = arith.mulf %114, %112 : vector<8x32xf32>
    %116 = arith.mulf %105, %90 : vector<8x32xf32>
    %117 = arith.addf %115, %116 : vector<8x32xf32>
    %118 = arith.truncf %117 : vector<8x32xf32> to vector<8x32xbf16>
    %cst_64 = arith.constant dense<0.000000e+00> : vector<8x96xf32>
    %119 = tpu.matmul %118, %84, %cst_64 {dimension_numbers = #tpu.dot_dimension_numbers<[1], [0], [0], [1], [0, 0, 1, 1], [], []>} : vector<8x32xbf16>, vector<32x96xbf16>, vector<8x96xf32> -> vector<8x96xf32>
    %120 = vector.broadcast %85 : vector<1x96xf32> to vector<8x96xf32>
    %121 = arith.addf %119, %120 : vector<8x96xf32>
    %122 = arith.truncf %90 : vector<8x32xf32> to vector<8x32xbf16>
    %cst_65 = arith.constant dense<0.000000e+00> : vector<8x96xf32>
    %123 = tpu.matmul %122, %86, %cst_65 {dimension_numbers = #tpu.dot_dimension_numbers<[1], [0], [0], [1], [0, 0, 1, 1], [], []>} : vector<8x32xbf16>, vector<32x96xbf16>, vector<8x96xf32> -> vector<8x96xf32>
    %124 = vector.extract_strided_slice %121 {offsets = [0, 0], sizes = [8, 64], strides = [1, 1]} : vector<8x96xf32> to vector<8x64xf32>
    %125 = vector.extract_strided_slice %123 {offsets = [0, 0], sizes = [8, 64], strides = [1, 1]} : vector<8x96xf32> to vector<8x64xf32>
    %126 = arith.addf %124, %125 : vector<8x64xf32>
    %127 = arith.negf %126 : vector<8x64xf32>
    %128 = math.exp %127 : vector<8x64xf32>
    %cst_66 = arith.constant 1.000000e+00 : f32
    %129 = vector.broadcast %cst_66 : f32 to vector<8x64xf32>
    %130 = arith.addf %129, %128 : vector<8x64xf32>
    %131 = arith.divf %129, %130 : vector<8x64xf32>
    %132 = vector.extract_strided_slice %131 {offsets = [0, 0], sizes = [8, 32], strides = [1, 1]} : vector<8x64xf32> to vector<8x32xf32>
    %133 = vector.extract_strided_slice %131 {offsets = [0, 32], sizes = [8, 32], strides = [1, 1]} : vector<8x64xf32> to vector<8x32xf32>
    %134 = vector.extract_strided_slice %121 {offsets = [0, 64], sizes = [8, 32], strides = [1, 1]} : vector<8x96xf32> to vector<8x32xf32>
    %135 = vector.extract_strided_slice %123 {offsets = [0, 64], sizes = [8, 32], strides = [1, 1]} : vector<8x96xf32> to vector<8x32xf32>
    %136 = vector.broadcast %87 : vector<1x32xf32> to vector<8x32xf32>
    %137 = arith.addf %135, %136 : vector<8x32xf32>
    %138 = arith.mulf %132, %137 : vector<8x32xf32>
    %139 = arith.addf %134, %138 : vector<8x32xf32>
    %140 = math.tanh %139 : vector<8x32xf32>
    %cst_67 = arith.constant 1.000000e+00 : f32
    %141 = vector.broadcast %cst_67 : f32 to vector<8x32xf32>
    %142 = arith.subf %141, %133 : vector<8x32xf32>
    %143 = arith.mulf %142, %140 : vector<8x32xf32>
    %144 = arith.mulf %133, %90 : vector<8x32xf32>
    %145 = arith.addf %143, %144 : vector<8x32xf32>
    %c0_68 = arith.constant 0 : index
    %c0_69 = arith.constant 0 : index
    %146 = vector.load %arg14[%c0_68, %c0_69] : memref<8x128xf32, #tpu.memory_space<vmem>>, vector<8x128xf32>
    %147 = arith.truncf %145 : vector<8x32xf32> to vector<8x32xbf16>
    %148 = arith.index_cast %c0_i32_58 : i32 to index
    %c0_70 = arith.constant 0 : index
    %c0_71 = arith.constant 0 : index
    %149 = vector.load %arg10[%148, %c0_70, %c0_71] : memref<8x32x128xbf16, #tpu.memory_space<vmem>>, vector<1x32x128xbf16>
    %150 = vector.shape_cast %149 : vector<1x32x128xbf16> to vector<32x128xbf16>
    %cst_72 = arith.constant dense<0.000000e+00> : vector<8x128xf32>
    %151 = tpu.matmul %147, %150, %cst_72 {dimension_numbers = #tpu.dot_dimension_numbers<[1], [0], [0], [1], [0, 0, 1, 1], [], []>} : vector<8x32xbf16>, vector<32x128xbf16>, vector<8x128xf32> -> vector<8x128xf32>
    %152 = arith.addf %146, %151 : vector<8x128xf32>
    %c0_73 = arith.constant 0 : index
    %c0_74 = arith.constant 0 : index
    %153 = vector.load %arg14[%c0_73, %c0_74] : memref<8x128xf32, #tpu.memory_space<vmem>>, vector<8x128xf32>
    tpu.vector_store %arg14[%c0_73, %c0_74], %152 {strides = array<i32>} : memref<8x128xf32, #tpu.memory_space<vmem>>, vector<8x128xf32>,
    %c1_i32_75 = arith.constant 1 : i32
    %154 = arith.index_cast %c1_i32_75 : i32 to index
    %c0_76 = arith.constant 0 : index
    %c0_77 = arith.constant 0 : index
    %155 = vector.load %arg13[%154, %c0_76, %c0_77] : memref<8x8x96xf32, #tpu.memory_space<vmem>>, vector<1x8x96xf32>
    %156 = vector.shape_cast %155 : vector<1x8x96xf32> to vector<8x96xf32>
    %157 = arith.truncf %117 : vector<8x32xf32> to vector<8x32xbf16>
    %cst_78 = arith.constant dense<0.000000e+00> : vector<8x96xf32>
    %158 = tpu.matmul %157, %82, %cst_78 {dimension_numbers = #tpu.dot_dimension_numbers<[1], [0], [0], [1], [0, 0, 1, 1], [], []>} : vector<8x32xbf16>, vector<32x96xbf16>, vector<8x96xf32> -> vector<8x96xf32>
    %159 = vector.extract_strided_slice %156 {offsets = [0, 0], sizes = [8, 64], strides = [1, 1]} : vector<8x96xf32> to vector<8x64xf32>
    %160 = vector.extract_strided_slice %158 {offsets = [0, 0], sizes = [8, 64], strides = [1, 1]} : vector<8x96xf32> to vector<8x64xf32>
    %161 = arith.addf %159, %160 : vector<8x64xf32>
    %162 = arith.negf %161 : vector<8x64xf32>
    %163 = math.exp %162 : vector<8x64xf32>
    %cst_79 = arith.constant 1.000000e+00 : f32
    %164 = vector.broadcast %cst_79 : f32 to vector<8x64xf32>
    %165 = arith.addf %164, %163 : vector<8x64xf32>
    %166 = arith.divf %164, %165 : vector<8x64xf32>
    %167 = vector.extract_strided_slice %166 {offsets = [0, 0], sizes = [8, 32], strides = [1, 1]} : vector<8x64xf32> to vector<8x32xf32>
    %168 = vector.extract_strided_slice %166 {offsets = [0, 32], sizes = [8, 32], strides = [1, 1]} : vector<8x64xf32> to vector<8x32xf32>
    %169 = vector.extract_strided_slice %156 {offsets = [0, 64], sizes = [8, 32], strides = [1, 1]} : vector<8x96xf32> to vector<8x32xf32>
    %170 = vector.extract_strided_slice %158 {offsets = [0, 64], sizes = [8, 32], strides = [1, 1]} : vector<8x96xf32> to vector<8x32xf32>
    %171 = vector.broadcast %83 : vector<1x32xf32> to vector<8x32xf32>
    %172 = arith.addf %170, %171 : vector<8x32xf32>
    %173 = arith.mulf %167, %172 : vector<8x32xf32>
    %174 = arith.addf %169, %173 : vector<8x32xf32>
    %175 = math.tanh %174 : vector<8x32xf32>
    %cst_80 = arith.constant 1.000000e+00 : f32
    %176 = vector.broadcast %cst_80 : f32 to vector<8x32xf32>
    %177 = arith.subf %176, %168 : vector<8x32xf32>
    %178 = arith.mulf %177, %175 : vector<8x32xf32>
    %179 = arith.mulf %168, %117 : vector<8x32xf32>
    %180 = arith.addf %178, %179 : vector<8x32xf32>
    %181 = arith.truncf %180 : vector<8x32xf32> to vector<8x32xbf16>
    %cst_81 = arith.constant dense<0.000000e+00> : vector<8x96xf32>
    %182 = tpu.matmul %181, %84, %cst_81 {dimension_numbers = #tpu.dot_dimension_numbers<[1], [0], [0], [1], [0, 0, 1, 1], [], []>} : vector<8x32xbf16>, vector<32x96xbf16>, vector<8x96xf32> -> vector<8x96xf32>
    %183 = vector.broadcast %85 : vector<1x96xf32> to vector<8x96xf32>
    %184 = arith.addf %182, %183 : vector<8x96xf32>
    %185 = arith.truncf %145 : vector<8x32xf32> to vector<8x32xbf16>
    %cst_82 = arith.constant dense<0.000000e+00> : vector<8x96xf32>
    %186 = tpu.matmul %185, %86, %cst_82 {dimension_numbers = #tpu.dot_dimension_numbers<[1], [0], [0], [1], [0, 0, 1, 1], [], []>} : vector<8x32xbf16>, vector<32x96xbf16>, vector<8x96xf32> -> vector<8x96xf32>
    %187 = vector.extract_strided_slice %184 {offsets = [0, 0], sizes = [8, 64], strides = [1, 1]} : vector<8x96xf32> to vector<8x64xf32>
    %188 = vector.extract_strided_slice %186 {offsets = [0, 0], sizes = [8, 64], strides = [1, 1]} : vector<8x96xf32> to vector<8x64xf32>
    %189 = arith.addf %187, %188 : vector<8x64xf32>
    %190 = arith.negf %189 : vector<8x64xf32>
    %191 = math.exp %190 : vector<8x64xf32>
    %cst_83 = arith.constant 1.000000e+00 : f32
    %192 = vector.broadcast %cst_83 : f32 to vector<8x64xf32>
    %193 = arith.addf %192, %191 : vector<8x64xf32>
    %194 = arith.divf %192, %193 : vector<8x64xf32>
    %195 = vector.extract_strided_slice %194 {offsets = [0, 0], sizes = [8, 32], strides = [1, 1]} : vector<8x64xf32> to vector<8x32xf32>
    %196 = vector.extract_strided_slice %194 {offsets = [0, 32], sizes = [8, 32], strides = [1, 1]} : vector<8x64xf32> to vector<8x32xf32>
    %197 = vector.extract_strided_slice %184 {offsets = [0, 64], sizes = [8, 32], strides = [1, 1]} : vector<8x96xf32> to vector<8x32xf32>
    %198 = vector.extract_strided_slice %186 {offsets = [0, 64], sizes = [8, 32], strides = [1, 1]} : vector<8x96xf32> to vector<8x32xf32>
    %199 = vector.broadcast %87 : vector<1x32xf32> to vector<8x32xf32>
    %200 = arith.addf %198, %199 : vector<8x32xf32>
    %201 = arith.mulf %195, %200 : vector<8x32xf32>
    %202 = arith.addf %197, %201 : vector<8x32xf32>
    %203 = math.tanh %202 : vector<8x32xf32>
    %cst_84 = arith.constant 1.000000e+00 : f32
    %204 = vector.broadcast %cst_84 : f32 to vector<8x32xf32>
    %205 = arith.subf %204, %196 : vector<8x32xf32>
    %206 = arith.mulf %205, %203 : vector<8x32xf32>
    %207 = arith.mulf %196, %145 : vector<8x32xf32>
    %208 = arith.addf %206, %207 : vector<8x32xf32>
    %c0_85 = arith.constant 0 : index
    %c0_86 = arith.constant 0 : index
    %209 = vector.load %arg14[%c0_85, %c0_86] : memref<8x128xf32, #tpu.memory_space<vmem>>, vector<8x128xf32>
    %210 = arith.truncf %208 : vector<8x32xf32> to vector<8x32xbf16>
    %211 = arith.index_cast %c1_i32_75 : i32 to index
    %c0_87 = arith.constant 0 : index
    %c0_88 = arith.constant 0 : index
    %212 = vector.load %arg10[%211, %c0_87, %c0_88] : memref<8x32x128xbf16, #tpu.memory_space<vmem>>, vector<1x32x128xbf16>
    %213 = vector.shape_cast %212 : vector<1x32x128xbf16> to vector<32x128xbf16>
    %cst_89 = arith.constant dense<0.000000e+00> : vector<8x128xf32>
    %214 = tpu.matmul %210, %213, %cst_89 {dimension_numbers = #tpu.dot_dimension_numbers<[1], [0], [0], [1], [0, 0, 1, 1], [], []>} : vector<8x32xbf16>, vector<32x128xbf16>, vector<8x128xf32> -> vector<8x128xf32>
    %215 = arith.addf %209, %214 : vector<8x128xf32>
    %c0_90 = arith.constant 0 : index
    %c0_91 = arith.constant 0 : index
    %216 = vector.load %arg14[%c0_90, %c0_91] : memref<8x128xf32, #tpu.memory_space<vmem>>, vector<8x128xf32>
    tpu.vector_store %arg14[%c0_90, %c0_91], %215 {strides = array<i32>} : memref<8x128xf32, #tpu.memory_space<vmem>>, vector<8x128xf32>,
    %c2_i32_92 = arith.constant 2 : i32
    %217 = arith.index_cast %c2_i32_92 : i32 to index
    %c0_93 = arith.constant 0 : index
    %c0_94 = arith.constant 0 : index
    %218 = vector.load %arg13[%217, %c0_93, %c0_94] : memref<8x8x96xf32, #tpu.memory_space<vmem>>, vector<1x8x96xf32>
    %219 = vector.shape_cast %218 : vector<1x8x96xf32> to vector<8x96xf32>
    %220 = arith.truncf %180 : vector<8x32xf32> to vector<8x32xbf16>
    %cst_95 = arith.constant dense<0.000000e+00> : vector<8x96xf32>
    %221 = tpu.matmul %220, %82, %cst_95 {dimension_numbers = #tpu.dot_dimension_numbers<[1], [0], [0], [1], [0, 0, 1, 1], [], []>} : vector<8x32xbf16>, vector<32x96xbf16>, vector<8x96xf32> -> vector<8x96xf32>
    %222 = vector.extract_strided_slice %219 {offsets = [0, 0], sizes = [8, 64], strides = [1, 1]} : vector<8x96xf32> to vector<8x64xf32>
    %223 = vector.extract_strided_slice %221 {offsets = [0, 0], sizes = [8, 64], strides = [1, 1]} : vector<8x96xf32> to vector<8x64xf32>
    %224 = arith.addf %222, %223 : vector<8x64xf32>
    %225 = arith.negf %224 : vector<8x64xf32>
    %226 = math.exp %225 : vector<8x64xf32>
    %cst_96 = arith.constant 1.000000e+00 : f32
    %227 = vector.broadcast %cst_96 : f32 to vector<8x64xf32>
    %228 = arith.addf %227, %226 : vector<8x64xf32>
    %229 = arith.divf %227, %228 : vector<8x64xf32>
    %230 = vector.extract_strided_slice %229 {offsets = [0, 0], sizes = [8, 32], strides = [1, 1]} : vector<8x64xf32> to vector<8x32xf32>
    %231 = vector.extract_strided_slice %229 {offsets = [0, 32], sizes = [8, 32], strides = [1, 1]} : vector<8x64xf32> to vector<8x32xf32>
    %232 = vector.extract_strided_slice %219 {offsets = [0, 64], sizes = [8, 32], strides = [1, 1]} : vector<8x96xf32> to vector<8x32xf32>
    %233 = vector.extract_strided_slice %221 {offsets = [0, 64], sizes = [8, 32], strides = [1, 1]} : vector<8x96xf32> to vector<8x32xf32>
    %234 = vector.broadcast %83 : vector<1x32xf32> to vector<8x32xf32>
    %235 = arith.addf %233, %234 : vector<8x32xf32>
    %236 = arith.mulf %230, %235 : vector<8x32xf32>
    %237 = arith.addf %232, %236 : vector<8x32xf32>
    %238 = math.tanh %237 : vector<8x32xf32>
    %cst_97 = arith.constant 1.000000e+00 : f32
    %239 = vector.broadcast %cst_97 : f32 to vector<8x32xf32>
    %240 = arith.subf %239, %231 : vector<8x32xf32>
    %241 = arith.mulf %240, %238 : vector<8x32xf32>
    %242 = arith.mulf %231, %180 : vector<8x32xf32>
    %243 = arith.addf %241, %242 : vector<8x32xf32>
    %244 = arith.truncf %243 : vector<8x32xf32> to vector<8x32xbf16>
    %cst_98 = arith.constant dense<0.000000e+00> : vector<8x96xf32>
    %245 = tpu.matmul %244, %84, %cst_98 {dimension_numbers = #tpu.dot_dimension_numbers<[1], [0], [0], [1], [0, 0, 1, 1], [], []>} : vector<8x32xbf16>, vector<32x96xbf16>, vector<8x96xf32> -> vector<8x96xf32>
    %246 = vector.broadcast %85 : vector<1x96xf32> to vector<8x96xf32>
    %247 = arith.addf %245, %246 : vector<8x96xf32>
    %248 = arith.truncf %208 : vector<8x32xf32> to vector<8x32xbf16>
    %cst_99 = arith.constant dense<0.000000e+00> : vector<8x96xf32>
    %249 = tpu.matmul %248, %86, %cst_99 {dimension_numbers = #tpu.dot_dimension_numbers<[1], [0], [0], [1], [0, 0, 1, 1], [], []>} : vector<8x32xbf16>, vector<32x96xbf16>, vector<8x96xf32> -> vector<8x96xf32>
    %250 = vector.extract_strided_slice %247 {offsets = [0, 0], sizes = [8, 64], strides = [1, 1]} : vector<8x96xf32> to vector<8x64xf32>
    %251 = vector.extract_strided_slice %249 {offsets = [0, 0], sizes = [8, 64], strides = [1, 1]} : vector<8x96xf32> to vector<8x64xf32>
    %252 = arith.addf %250, %251 : vector<8x64xf32>
    %253 = arith.negf %252 : vector<8x64xf32>
    %254 = math.exp %253 : vector<8x64xf32>
    %cst_100 = arith.constant 1.000000e+00 : f32
    %255 = vector.broadcast %cst_100 : f32 to vector<8x64xf32>
    %256 = arith.addf %255, %254 : vector<8x64xf32>
    %257 = arith.divf %255, %256 : vector<8x64xf32>
    %258 = vector.extract_strided_slice %257 {offsets = [0, 0], sizes = [8, 32], strides = [1, 1]} : vector<8x64xf32> to vector<8x32xf32>
    %259 = vector.extract_strided_slice %257 {offsets = [0, 32], sizes = [8, 32], strides = [1, 1]} : vector<8x64xf32> to vector<8x32xf32>
    %260 = vector.extract_strided_slice %247 {offsets = [0, 64], sizes = [8, 32], strides = [1, 1]} : vector<8x96xf32> to vector<8x32xf32>
    %261 = vector.extract_strided_slice %249 {offsets = [0, 64], sizes = [8, 32], strides = [1, 1]} : vector<8x96xf32> to vector<8x32xf32>
    %262 = vector.broadcast %87 : vector<1x32xf32> to vector<8x32xf32>
    %263 = arith.addf %261, %262 : vector<8x32xf32>
    %264 = arith.mulf %258, %263 : vector<8x32xf32>
    %265 = arith.addf %260, %264 : vector<8x32xf32>
    %266 = math.tanh %265 : vector<8x32xf32>
    %cst_101 = arith.constant 1.000000e+00 : f32
    %267 = vector.broadcast %cst_101 : f32 to vector<8x32xf32>
    %268 = arith.subf %267, %259 : vector<8x32xf32>
    %269 = arith.mulf %268, %266 : vector<8x32xf32>
    %270 = arith.mulf %259, %208 : vector<8x32xf32>
    %271 = arith.addf %269, %270 : vector<8x32xf32>
    %c0_102 = arith.constant 0 : index
    %c0_103 = arith.constant 0 : index
    %272 = vector.load %arg14[%c0_102, %c0_103] : memref<8x128xf32, #tpu.memory_space<vmem>>, vector<8x128xf32>
    %273 = arith.truncf %271 : vector<8x32xf32> to vector<8x32xbf16>
    %274 = arith.index_cast %c2_i32_92 : i32 to index
    %c0_104 = arith.constant 0 : index
    %c0_105 = arith.constant 0 : index
    %275 = vector.load %arg10[%274, %c0_104, %c0_105] : memref<8x32x128xbf16, #tpu.memory_space<vmem>>, vector<1x32x128xbf16>
    %276 = vector.shape_cast %275 : vector<1x32x128xbf16> to vector<32x128xbf16>
    %cst_106 = arith.constant dense<0.000000e+00> : vector<8x128xf32>
    %277 = tpu.matmul %273, %276, %cst_106 {dimension_numbers = #tpu.dot_dimension_numbers<[1], [0], [0], [1], [0, 0, 1, 1], [], []>} : vector<8x32xbf16>, vector<32x128xbf16>, vector<8x128xf32> -> vector<8x128xf32>
    %278 = arith.addf %272, %277 : vector<8x128xf32>
    %c0_107 = arith.constant 0 : index
    %c0_108 = arith.constant 0 : index
    %279 = vector.load %arg14[%c0_107, %c0_108] : memref<8x128xf32, #tpu.memory_space<vmem>>, vector<8x128xf32>
    tpu.vector_store %arg14[%c0_107, %c0_108], %278 {strides = array<i32>} : memref<8x128xf32, #tpu.memory_space<vmem>>, vector<8x128xf32>,
    %c3_i32_109 = arith.constant 3 : i32
    %280 = arith.index_cast %c3_i32_109 : i32 to index
    %c0_110 = arith.constant 0 : index
    %c0_111 = arith.constant 0 : index
    %281 = vector.load %arg13[%280, %c0_110, %c0_111] : memref<8x8x96xf32, #tpu.memory_space<vmem>>, vector<1x8x96xf32>
    %282 = vector.shape_cast %281 : vector<1x8x96xf32> to vector<8x96xf32>
    %283 = arith.truncf %243 : vector<8x32xf32> to vector<8x32xbf16>
    %cst_112 = arith.constant dense<0.000000e+00> : vector<8x96xf32>
    %284 = tpu.matmul %283, %82, %cst_112 {dimension_numbers = #tpu.dot_dimension_numbers<[1], [0], [0], [1], [0, 0, 1, 1], [], []>} : vector<8x32xbf16>, vector<32x96xbf16>, vector<8x96xf32> -> vector<8x96xf32>
    %285 = vector.extract_strided_slice %282 {offsets = [0, 0], sizes = [8, 64], strides = [1, 1]} : vector<8x96xf32> to vector<8x64xf32>
    %286 = vector.extract_strided_slice %284 {offsets = [0, 0], sizes = [8, 64], strides = [1, 1]} : vector<8x96xf32> to vector<8x64xf32>
    %287 = arith.addf %285, %286 : vector<8x64xf32>
    %288 = arith.negf %287 : vector<8x64xf32>
    %289 = math.exp %288 : vector<8x64xf32>
    %cst_113 = arith.constant 1.000000e+00 : f32
    %290 = vector.broadcast %cst_113 : f32 to vector<8x64xf32>
    %291 = arith.addf %290, %289 : vector<8x64xf32>
    %292 = arith.divf %290, %291 : vector<8x64xf32>
    %293 = vector.extract_strided_slice %292 {offsets = [0, 0], sizes = [8, 32], strides = [1, 1]} : vector<8x64xf32> to vector<8x32xf32>
    %294 = vector.extract_strided_slice %292 {offsets = [0, 32], sizes = [8, 32], strides = [1, 1]} : vector<8x64xf32> to vector<8x32xf32>
    %295 = vector.extract_strided_slice %282 {offsets = [0, 64], sizes = [8, 32], strides = [1, 1]} : vector<8x96xf32> to vector<8x32xf32>
    %296 = vector.extract_strided_slice %284 {offsets = [0, 64], sizes = [8, 32], strides = [1, 1]} : vector<8x96xf32> to vector<8x32xf32>
    %297 = vector.broadcast %83 : vector<1x32xf32> to vector<8x32xf32>
    %298 = arith.addf %296, %297 : vector<8x32xf32>
    %299 = arith.mulf %293, %298 : vector<8x32xf32>
    %300 = arith.addf %295, %299 : vector<8x32xf32>
    %301 = math.tanh %300 : vector<8x32xf32>
    %cst_114 = arith.constant 1.000000e+00 : f32
    %302 = vector.broadcast %cst_114 : f32 to vector<8x32xf32>
    %303 = arith.subf %302, %294 : vector<8x32xf32>
    %304 = arith.mulf %303, %301 : vector<8x32xf32>
    %305 = arith.mulf %294, %243 : vector<8x32xf32>
    %306 = arith.addf %304, %305 : vector<8x32xf32>
    %307 = arith.truncf %306 : vector<8x32xf32> to vector<8x32xbf16>
    %cst_115 = arith.constant dense<0.000000e+00> : vector<8x96xf32>
    %308 = tpu.matmul %307, %84, %cst_115 {dimension_numbers = #tpu.dot_dimension_numbers<[1], [0], [0], [1], [0, 0, 1, 1], [], []>} : vector<8x32xbf16>, vector<32x96xbf16>, vector<8x96xf32> -> vector<8x96xf32>
    %309 = vector.broadcast %85 : vector<1x96xf32> to vector<8x96xf32>
    %310 = arith.addf %308, %309 : vector<8x96xf32>
    %311 = arith.truncf %271 : vector<8x32xf32> to vector<8x32xbf16>
    %cst_116 = arith.constant dense<0.000000e+00> : vector<8x96xf32>
    %312 = tpu.matmul %311, %86, %cst_116 {dimension_numbers = #tpu.dot_dimension_numbers<[1], [0], [0], [1], [0, 0, 1, 1], [], []>} : vector<8x32xbf16>, vector<32x96xbf16>, vector<8x96xf32> -> vector<8x96xf32>
    %313 = vector.extract_strided_slice %310 {offsets = [0, 0], sizes = [8, 64], strides = [1, 1]} : vector<8x96xf32> to vector<8x64xf32>
    %314 = vector.extract_strided_slice %312 {offsets = [0, 0], sizes = [8, 64], strides = [1, 1]} : vector<8x96xf32> to vector<8x64xf32>
    %315 = arith.addf %313, %314 : vector<8x64xf32>
    %316 = arith.negf %315 : vector<8x64xf32>
    %317 = math.exp %316 : vector<8x64xf32>
    %cst_117 = arith.constant 1.000000e+00 : f32
    %318 = vector.broadcast %cst_117 : f32 to vector<8x64xf32>
    %319 = arith.addf %318, %317 : vector<8x64xf32>
    %320 = arith.divf %318, %319 : vector<8x64xf32>
    %321 = vector.extract_strided_slice %320 {offsets = [0, 0], sizes = [8, 32], strides = [1, 1]} : vector<8x64xf32> to vector<8x32xf32>
    %322 = vector.extract_strided_slice %320 {offsets = [0, 32], sizes = [8, 32], strides = [1, 1]} : vector<8x64xf32> to vector<8x32xf32>
    %323 = vector.extract_strided_slice %310 {offsets = [0, 64], sizes = [8, 32], strides = [1, 1]} : vector<8x96xf32> to vector<8x32xf32>
    %324 = vector.extract_strided_slice %312 {offsets = [0, 64], sizes = [8, 32], strides = [1, 1]} : vector<8x96xf32> to vector<8x32xf32>
    %325 = vector.broadcast %87 : vector<1x32xf32> to vector<8x32xf32>
    %326 = arith.addf %324, %325 : vector<8x32xf32>
    %327 = arith.mulf %321, %326 : vector<8x32xf32>
    %328 = arith.addf %323, %327 : vector<8x32xf32>
    %329 = math.tanh %328 : vector<8x32xf32>
    %cst_118 = arith.constant 1.000000e+00 : f32
    %330 = vector.broadcast %cst_118 : f32 to vector<8x32xf32>
    %331 = arith.subf %330, %322 : vector<8x32xf32>
    %332 = arith.mulf %331, %329 : vector<8x32xf32>
    %333 = arith.mulf %322, %271 : vector<8x32xf32>
    %334 = arith.addf %332, %333 : vector<8x32xf32>
    %c0_119 = arith.constant 0 : index
    %c0_120 = arith.constant 0 : index
    %335 = vector.load %arg14[%c0_119, %c0_120] : memref<8x128xf32, #tpu.memory_space<vmem>>, vector<8x128xf32>
    %336 = arith.truncf %334 : vector<8x32xf32> to vector<8x32xbf16>
    %337 = arith.index_cast %c3_i32_109 : i32 to index
    %c0_121 = arith.constant 0 : index
    %c0_122 = arith.constant 0 : index
    %338 = vector.load %arg10[%337, %c0_121, %c0_122] : memref<8x32x128xbf16, #tpu.memory_space<vmem>>, vector<1x32x128xbf16>
    %339 = vector.shape_cast %338 : vector<1x32x128xbf16> to vector<32x128xbf16>
    %cst_123 = arith.constant dense<0.000000e+00> : vector<8x128xf32>
    %340 = tpu.matmul %336, %339, %cst_123 {dimension_numbers = #tpu.dot_dimension_numbers<[1], [0], [0], [1], [0, 0, 1, 1], [], []>} : vector<8x32xbf16>, vector<32x128xbf16>, vector<8x128xf32> -> vector<8x128xf32>
    %341 = arith.addf %335, %340 : vector<8x128xf32>
    %c0_124 = arith.constant 0 : index
    %c0_125 = arith.constant 0 : index
    %342 = vector.load %arg14[%c0_124, %c0_125] : memref<8x128xf32, #tpu.memory_space<vmem>>, vector<8x128xf32>
    tpu.vector_store %arg14[%c0_124, %c0_125], %341 {strides = array<i32>} : memref<8x128xf32, #tpu.memory_space<vmem>>, vector<8x128xf32>,
    %c4_i32_126 = arith.constant 4 : i32
    %343 = arith.index_cast %c4_i32_126 : i32 to index
    %c0_127 = arith.constant 0 : index
    %c0_128 = arith.constant 0 : index
    %344 = vector.load %arg13[%343, %c0_127, %c0_128] : memref<8x8x96xf32, #tpu.memory_space<vmem>>, vector<1x8x96xf32>
    %345 = vector.shape_cast %344 : vector<1x8x96xf32> to vector<8x96xf32>
    %346 = arith.truncf %306 : vector<8x32xf32> to vector<8x32xbf16>
    %cst_129 = arith.constant dense<0.000000e+00> : vector<8x96xf32>
    %347 = tpu.matmul %346, %82, %cst_129 {dimension_numbers = #tpu.dot_dimension_numbers<[1], [0], [0], [1], [0, 0, 1, 1], [], []>} : vector<8x32xbf16>, vector<32x96xbf16>, vector<8x96xf32> -> vector<8x96xf32>
    %348 = vector.extract_strided_slice %345 {offsets = [0, 0], sizes = [8, 64], strides = [1, 1]} : vector<8x96xf32> to vector<8x64xf32>
    %349 = vector.extract_strided_slice %347 {offsets = [0, 0], sizes = [8, 64], strides = [1, 1]} : vector<8x96xf32> to vector<8x64xf32>
    %350 = arith.addf %348, %349 : vector<8x64xf32>
    %351 = arith.negf %350 : vector<8x64xf32>
    %352 = math.exp %351 : vector<8x64xf32>
    %cst_130 = arith.constant 1.000000e+00 : f32
    %353 = vector.broadcast %cst_130 : f32 to vector<8x64xf32>
    %354 = arith.addf %353, %352 : vector<8x64xf32>
    %355 = arith.divf %353, %354 : vector<8x64xf32>
    %356 = vector.extract_strided_slice %355 {offsets = [0, 0], sizes = [8, 32], strides = [1, 1]} : vector<8x64xf32> to vector<8x32xf32>
    %357 = vector.extract_strided_slice %355 {offsets = [0, 32], sizes = [8, 32], strides = [1, 1]} : vector<8x64xf32> to vector<8x32xf32>
    %358 = vector.extract_strided_slice %345 {offsets = [0, 64], sizes = [8, 32], strides = [1, 1]} : vector<8x96xf32> to vector<8x32xf32>
    %359 = vector.extract_strided_slice %347 {offsets = [0, 64], sizes = [8, 32], strides = [1, 1]} : vector<8x96xf32> to vector<8x32xf32>
    %360 = vector.broadcast %83 : vector<1x32xf32> to vector<8x32xf32>
    %361 = arith.addf %359, %360 : vector<8x32xf32>
    %362 = arith.mulf %356, %361 : vector<8x32xf32>
    %363 = arith.addf %358, %362 : vector<8x32xf32>
    %364 = math.tanh %363 : vector<8x32xf32>
    %cst_131 = arith.constant 1.000000e+00 : f32
    %365 = vector.broadcast %cst_131 : f32 to vector<8x32xf32>
    %366 = arith.subf %365, %357 : vector<8x32xf32>
    %367 = arith.mulf %366, %364 : vector<8x32xf32>
    %368 = arith.mulf %357, %306 : vector<8x32xf32>
    %369 = arith.addf %367, %368 : vector<8x32xf32>
    %370 = arith.truncf %369 : vector<8x32xf32> to vector<8x32xbf16>
    %cst_132 = arith.constant dense<0.000000e+00> : vector<8x96xf32>
    %371 = tpu.matmul %370, %84, %cst_132 {dimension_numbers = #tpu.dot_dimension_numbers<[1], [0], [0], [1], [0, 0, 1, 1], [], []>} : vector<8x32xbf16>, vector<32x96xbf16>, vector<8x96xf32> -> vector<8x96xf32>
    %372 = vector.broadcast %85 : vector<1x96xf32> to vector<8x96xf32>
    %373 = arith.addf %371, %372 : vector<8x96xf32>
    %374 = arith.truncf %334 : vector<8x32xf32> to vector<8x32xbf16>
    %cst_133 = arith.constant dense<0.000000e+00> : vector<8x96xf32>
    %375 = tpu.matmul %374, %86, %cst_133 {dimension_numbers = #tpu.dot_dimension_numbers<[1], [0], [0], [1], [0, 0, 1, 1], [], []>} : vector<8x32xbf16>, vector<32x96xbf16>, vector<8x96xf32> -> vector<8x96xf32>
    %376 = vector.extract_strided_slice %373 {offsets = [0, 0], sizes = [8, 64], strides = [1, 1]} : vector<8x96xf32> to vector<8x64xf32>
    %377 = vector.extract_strided_slice %375 {offsets = [0, 0], sizes = [8, 64], strides = [1, 1]} : vector<8x96xf32> to vector<8x64xf32>
    %378 = arith.addf %376, %377 : vector<8x64xf32>
    %379 = arith.negf %378 : vector<8x64xf32>
    %380 = math.exp %379 : vector<8x64xf32>
    %cst_134 = arith.constant 1.000000e+00 : f32
    %381 = vector.broadcast %cst_134 : f32 to vector<8x64xf32>
    %382 = arith.addf %381, %380 : vector<8x64xf32>
    %383 = arith.divf %381, %382 : vector<8x64xf32>
    %384 = vector.extract_strided_slice %383 {offsets = [0, 0], sizes = [8, 32], strides = [1, 1]} : vector<8x64xf32> to vector<8x32xf32>
    %385 = vector.extract_strided_slice %383 {offsets = [0, 32], sizes = [8, 32], strides = [1, 1]} : vector<8x64xf32> to vector<8x32xf32>
    %386 = vector.extract_strided_slice %373 {offsets = [0, 64], sizes = [8, 32], strides = [1, 1]} : vector<8x96xf32> to vector<8x32xf32>
    %387 = vector.extract_strided_slice %375 {offsets = [0, 64], sizes = [8, 32], strides = [1, 1]} : vector<8x96xf32> to vector<8x32xf32>
    %388 = vector.broadcast %87 : vector<1x32xf32> to vector<8x32xf32>
    %389 = arith.addf %387, %388 : vector<8x32xf32>
    %390 = arith.mulf %384, %389 : vector<8x32xf32>
    %391 = arith.addf %386, %390 : vector<8x32xf32>
    %392 = math.tanh %391 : vector<8x32xf32>
    %cst_135 = arith.constant 1.000000e+00 : f32
    %393 = vector.broadcast %cst_135 : f32 to vector<8x32xf32>
    %394 = arith.subf %393, %385 : vector<8x32xf32>
    %395 = arith.mulf %394, %392 : vector<8x32xf32>
    %396 = arith.mulf %385, %334 : vector<8x32xf32>
    %397 = arith.addf %395, %396 : vector<8x32xf32>
    %c0_136 = arith.constant 0 : index
    %c0_137 = arith.constant 0 : index
    %398 = vector.load %arg14[%c0_136, %c0_137] : memref<8x128xf32, #tpu.memory_space<vmem>>, vector<8x128xf32>
    %399 = arith.truncf %397 : vector<8x32xf32> to vector<8x32xbf16>
    %400 = arith.index_cast %c4_i32_126 : i32 to index
    %c0_138 = arith.constant 0 : index
    %c0_139 = arith.constant 0 : index
    %401 = vector.load %arg10[%400, %c0_138, %c0_139] : memref<8x32x128xbf16, #tpu.memory_space<vmem>>, vector<1x32x128xbf16>
    %402 = vector.shape_cast %401 : vector<1x32x128xbf16> to vector<32x128xbf16>
    %cst_140 = arith.constant dense<0.000000e+00> : vector<8x128xf32>
    %403 = tpu.matmul %399, %402, %cst_140 {dimension_numbers = #tpu.dot_dimension_numbers<[1], [0], [0], [1], [0, 0, 1, 1], [], []>} : vector<8x32xbf16>, vector<32x128xbf16>, vector<8x128xf32> -> vector<8x128xf32>
    %404 = arith.addf %398, %403 : vector<8x128xf32>
    %c0_141 = arith.constant 0 : index
    %c0_142 = arith.constant 0 : index
    %405 = vector.load %arg14[%c0_141, %c0_142] : memref<8x128xf32, #tpu.memory_space<vmem>>, vector<8x128xf32>
    tpu.vector_store %arg14[%c0_141, %c0_142], %404 {strides = array<i32>} : memref<8x128xf32, #tpu.memory_space<vmem>>, vector<8x128xf32>,
    %c5_i32_143 = arith.constant 5 : i32
    %406 = arith.index_cast %c5_i32_143 : i32 to index
    %c0_144 = arith.constant 0 : index
    %c0_145 = arith.constant 0 : index
    %407 = vector.load %arg13[%406, %c0_144, %c0_145] : memref<8x8x96xf32, #tpu.memory_space<vmem>>, vector<1x8x96xf32>
    %408 = vector.shape_cast %407 : vector<1x8x96xf32> to vector<8x96xf32>
    %409 = arith.truncf %369 : vector<8x32xf32> to vector<8x32xbf16>
    %cst_146 = arith.constant dense<0.000000e+00> : vector<8x96xf32>
    %410 = tpu.matmul %409, %82, %cst_146 {dimension_numbers = #tpu.dot_dimension_numbers<[1], [0], [0], [1], [0, 0, 1, 1], [], []>} : vector<8x32xbf16>, vector<32x96xbf16>, vector<8x96xf32> -> vector<8x96xf32>
    %411 = vector.extract_strided_slice %408 {offsets = [0, 0], sizes = [8, 64], strides = [1, 1]} : vector<8x96xf32> to vector<8x64xf32>
    %412 = vector.extract_strided_slice %410 {offsets = [0, 0], sizes = [8, 64], strides = [1, 1]} : vector<8x96xf32> to vector<8x64xf32>
    %413 = arith.addf %411, %412 : vector<8x64xf32>
    %414 = arith.negf %413 : vector<8x64xf32>
    %415 = math.exp %414 : vector<8x64xf32>
    %cst_147 = arith.constant 1.000000e+00 : f32
    %416 = vector.broadcast %cst_147 : f32 to vector<8x64xf32>
    %417 = arith.addf %416, %415 : vector<8x64xf32>
    %418 = arith.divf %416, %417 : vector<8x64xf32>
    %419 = vector.extract_strided_slice %418 {offsets = [0, 0], sizes = [8, 32], strides = [1, 1]} : vector<8x64xf32> to vector<8x32xf32>
    %420 = vector.extract_strided_slice %418 {offsets = [0, 32], sizes = [8, 32], strides = [1, 1]} : vector<8x64xf32> to vector<8x32xf32>
    %421 = vector.extract_strided_slice %408 {offsets = [0, 64], sizes = [8, 32], strides = [1, 1]} : vector<8x96xf32> to vector<8x32xf32>
    %422 = vector.extract_strided_slice %410 {offsets = [0, 64], sizes = [8, 32], strides = [1, 1]} : vector<8x96xf32> to vector<8x32xf32>
    %423 = vector.broadcast %83 : vector<1x32xf32> to vector<8x32xf32>
    %424 = arith.addf %422, %423 : vector<8x32xf32>
    %425 = arith.mulf %419, %424 : vector<8x32xf32>
    %426 = arith.addf %421, %425 : vector<8x32xf32>
    %427 = math.tanh %426 : vector<8x32xf32>
    %cst_148 = arith.constant 1.000000e+00 : f32
    %428 = vector.broadcast %cst_148 : f32 to vector<8x32xf32>
    %429 = arith.subf %428, %420 : vector<8x32xf32>
    %430 = arith.mulf %429, %427 : vector<8x32xf32>
    %431 = arith.mulf %420, %369 : vector<8x32xf32>
    %432 = arith.addf %430, %431 : vector<8x32xf32>
    %433 = arith.truncf %432 : vector<8x32xf32> to vector<8x32xbf16>
    %cst_149 = arith.constant dense<0.000000e+00> : vector<8x96xf32>
    %434 = tpu.matmul %433, %84, %cst_149 {dimension_numbers = #tpu.dot_dimension_numbers<[1], [0], [0], [1], [0, 0, 1, 1], [], []>} : vector<8x32xbf16>, vector<32x96xbf16>, vector<8x96xf32> -> vector<8x96xf32>
    %435 = vector.broadcast %85 : vector<1x96xf32> to vector<8x96xf32>
    %436 = arith.addf %434, %435 : vector<8x96xf32>
    %437 = arith.truncf %397 : vector<8x32xf32> to vector<8x32xbf16>
    %cst_150 = arith.constant dense<0.000000e+00> : vector<8x96xf32>
    %438 = tpu.matmul %437, %86, %cst_150 {dimension_numbers = #tpu.dot_dimension_numbers<[1], [0], [0], [1], [0, 0, 1, 1], [], []>} : vector<8x32xbf16>, vector<32x96xbf16>, vector<8x96xf32> -> vector<8x96xf32>
    %439 = vector.extract_strided_slice %436 {offsets = [0, 0], sizes = [8, 64], strides = [1, 1]} : vector<8x96xf32> to vector<8x64xf32>
    %440 = vector.extract_strided_slice %438 {offsets = [0, 0], sizes = [8, 64], strides = [1, 1]} : vector<8x96xf32> to vector<8x64xf32>
    %441 = arith.addf %439, %440 : vector<8x64xf32>
    %442 = arith.negf %441 : vector<8x64xf32>
    %443 = math.exp %442 : vector<8x64xf32>
    %cst_151 = arith.constant 1.000000e+00 : f32
    %444 = vector.broadcast %cst_151 : f32 to vector<8x64xf32>
    %445 = arith.addf %444, %443 : vector<8x64xf32>
    %446 = arith.divf %444, %445 : vector<8x64xf32>
    %447 = vector.extract_strided_slice %446 {offsets = [0, 0], sizes = [8, 32], strides = [1, 1]} : vector<8x64xf32> to vector<8x32xf32>
    %448 = vector.extract_strided_slice %446 {offsets = [0, 32], sizes = [8, 32], strides = [1, 1]} : vector<8x64xf32> to vector<8x32xf32>
    %449 = vector.extract_strided_slice %436 {offsets = [0, 64], sizes = [8, 32], strides = [1, 1]} : vector<8x96xf32> to vector<8x32xf32>
    %450 = vector.extract_strided_slice %438 {offsets = [0, 64], sizes = [8, 32], strides = [1, 1]} : vector<8x96xf32> to vector<8x32xf32>
    %451 = vector.broadcast %87 : vector<1x32xf32> to vector<8x32xf32>
    %452 = arith.addf %450, %451 : vector<8x32xf32>
    %453 = arith.mulf %447, %452 : vector<8x32xf32>
    %454 = arith.addf %449, %453 : vector<8x32xf32>
    %455 = math.tanh %454 : vector<8x32xf32>
    %cst_152 = arith.constant 1.000000e+00 : f32
    %456 = vector.broadcast %cst_152 : f32 to vector<8x32xf32>
    %457 = arith.subf %456, %448 : vector<8x32xf32>
    %458 = arith.mulf %457, %455 : vector<8x32xf32>
    %459 = arith.mulf %448, %397 : vector<8x32xf32>
    %460 = arith.addf %458, %459 : vector<8x32xf32>
    %c0_153 = arith.constant 0 : index
    %c0_154 = arith.constant 0 : index
    %461 = vector.load %arg14[%c0_153, %c0_154] : memref<8x128xf32, #tpu.memory_space<vmem>>, vector<8x128xf32>
    %462 = arith.truncf %460 : vector<8x32xf32> to vector<8x32xbf16>
    %463 = arith.index_cast %c5_i32_143 : i32 to index
    %c0_155 = arith.constant 0 : index
    %c0_156 = arith.constant 0 : index
    %464 = vector.load %arg10[%463, %c0_155, %c0_156] : memref<8x32x128xbf16, #tpu.memory_space<vmem>>, vector<1x32x128xbf16>
    %465 = vector.shape_cast %464 : vector<1x32x128xbf16> to vector<32x128xbf16>
    %cst_157 = arith.constant dense<0.000000e+00> : vector<8x128xf32>
    %466 = tpu.matmul %462, %465, %cst_157 {dimension_numbers = #tpu.dot_dimension_numbers<[1], [0], [0], [1], [0, 0, 1, 1], [], []>} : vector<8x32xbf16>, vector<32x128xbf16>, vector<8x128xf32> -> vector<8x128xf32>
    %467 = arith.addf %461, %466 : vector<8x128xf32>
    %c0_158 = arith.constant 0 : index
    %c0_159 = arith.constant 0 : index
    %468 = vector.load %arg14[%c0_158, %c0_159] : memref<8x128xf32, #tpu.memory_space<vmem>>, vector<8x128xf32>
    tpu.vector_store %arg14[%c0_158, %c0_159], %467 {strides = array<i32>} : memref<8x128xf32, #tpu.memory_space<vmem>>, vector<8x128xf32>,
    %c6_i32_160 = arith.constant 6 : i32
    %469 = arith.index_cast %c6_i32_160 : i32 to index
    %c0_161 = arith.constant 0 : index
    %c0_162 = arith.constant 0 : index
    %470 = vector.load %arg13[%469, %c0_161, %c0_162] : memref<8x8x96xf32, #tpu.memory_space<vmem>>, vector<1x8x96xf32>
    %471 = vector.shape_cast %470 : vector<1x8x96xf32> to vector<8x96xf32>
    %472 = arith.truncf %432 : vector<8x32xf32> to vector<8x32xbf16>
    %cst_163 = arith.constant dense<0.000000e+00> : vector<8x96xf32>
    %473 = tpu.matmul %472, %82, %cst_163 {dimension_numbers = #tpu.dot_dimension_numbers<[1], [0], [0], [1], [0, 0, 1, 1], [], []>} : vector<8x32xbf16>, vector<32x96xbf16>, vector<8x96xf32> -> vector<8x96xf32>
    %474 = vector.extract_strided_slice %471 {offsets = [0, 0], sizes = [8, 64], strides = [1, 1]} : vector<8x96xf32> to vector<8x64xf32>
    %475 = vector.extract_strided_slice %473 {offsets = [0, 0], sizes = [8, 64], strides = [1, 1]} : vector<8x96xf32> to vector<8x64xf32>
    %476 = arith.addf %474, %475 : vector<8x64xf32>
    %477 = arith.negf %476 : vector<8x64xf32>
    %478 = math.exp %477 : vector<8x64xf32>
    %cst_164 = arith.constant 1.000000e+00 : f32
    %479 = vector.broadcast %cst_164 : f32 to vector<8x64xf32>
    %480 = arith.addf %479, %478 : vector<8x64xf32>
    %481 = arith.divf %479, %480 : vector<8x64xf32>
    %482 = vector.extract_strided_slice %481 {offsets = [0, 0], sizes = [8, 32], strides = [1, 1]} : vector<8x64xf32> to vector<8x32xf32>
    %483 = vector.extract_strided_slice %481 {offsets = [0, 32], sizes = [8, 32], strides = [1, 1]} : vector<8x64xf32> to vector<8x32xf32>
    %484 = vector.extract_strided_slice %471 {offsets = [0, 64], sizes = [8, 32], strides = [1, 1]} : vector<8x96xf32> to vector<8x32xf32>
    %485 = vector.extract_strided_slice %473 {offsets = [0, 64], sizes = [8, 32], strides = [1, 1]} : vector<8x96xf32> to vector<8x32xf32>
    %486 = vector.broadcast %83 : vector<1x32xf32> to vector<8x32xf32>
    %487 = arith.addf %485, %486 : vector<8x32xf32>
    %488 = arith.mulf %482, %487 : vector<8x32xf32>
    %489 = arith.addf %484, %488 : vector<8x32xf32>
    %490 = math.tanh %489 : vector<8x32xf32>
    %cst_165 = arith.constant 1.000000e+00 : f32
    %491 = vector.broadcast %cst_165 : f32 to vector<8x32xf32>
    %492 = arith.subf %491, %483 : vector<8x32xf32>
    %493 = arith.mulf %492, %490 : vector<8x32xf32>
    %494 = arith.mulf %483, %432 : vector<8x32xf32>
    %495 = arith.addf %493, %494 : vector<8x32xf32>
    %496 = arith.truncf %495 : vector<8x32xf32> to vector<8x32xbf16>
    %cst_166 = arith.constant dense<0.000000e+00> : vector<8x96xf32>
    %497 = tpu.matmul %496, %84, %cst_166 {dimension_numbers = #tpu.dot_dimension_numbers<[1], [0], [0], [1], [0, 0, 1, 1], [], []>} : vector<8x32xbf16>, vector<32x96xbf16>, vector<8x96xf32> -> vector<8x96xf32>
    %498 = vector.broadcast %85 : vector<1x96xf32> to vector<8x96xf32>
    %499 = arith.addf %497, %498 : vector<8x96xf32>
    %500 = arith.truncf %460 : vector<8x32xf32> to vector<8x32xbf16>
    %cst_167 = arith.constant dense<0.000000e+00> : vector<8x96xf32>
    %501 = tpu.matmul %500, %86, %cst_167 {dimension_numbers = #tpu.dot_dimension_numbers<[1], [0], [0], [1], [0, 0, 1, 1], [], []>} : vector<8x32xbf16>, vector<32x96xbf16>, vector<8x96xf32> -> vector<8x96xf32>
    %502 = vector.extract_strided_slice %499 {offsets = [0, 0], sizes = [8, 64], strides = [1, 1]} : vector<8x96xf32> to vector<8x64xf32>
    %503 = vector.extract_strided_slice %501 {offsets = [0, 0], sizes = [8, 64], strides = [1, 1]} : vector<8x96xf32> to vector<8x64xf32>
    %504 = arith.addf %502, %503 : vector<8x64xf32>
    %505 = arith.negf %504 : vector<8x64xf32>
    %506 = math.exp %505 : vector<8x64xf32>
    %cst_168 = arith.constant 1.000000e+00 : f32
    %507 = vector.broadcast %cst_168 : f32 to vector<8x64xf32>
    %508 = arith.addf %507, %506 : vector<8x64xf32>
    %509 = arith.divf %507, %508 : vector<8x64xf32>
    %510 = vector.extract_strided_slice %509 {offsets = [0, 0], sizes = [8, 32], strides = [1, 1]} : vector<8x64xf32> to vector<8x32xf32>
    %511 = vector.extract_strided_slice %509 {offsets = [0, 32], sizes = [8, 32], strides = [1, 1]} : vector<8x64xf32> to vector<8x32xf32>
    %512 = vector.extract_strided_slice %499 {offsets = [0, 64], sizes = [8, 32], strides = [1, 1]} : vector<8x96xf32> to vector<8x32xf32>
    %513 = vector.extract_strided_slice %501 {offsets = [0, 64], sizes = [8, 32], strides = [1, 1]} : vector<8x96xf32> to vector<8x32xf32>
    %514 = vector.broadcast %87 : vector<1x32xf32> to vector<8x32xf32>
    %515 = arith.addf %513, %514 : vector<8x32xf32>
    %516 = arith.mulf %510, %515 : vector<8x32xf32>
    %517 = arith.addf %512, %516 : vector<8x32xf32>
    %518 = math.tanh %517 : vector<8x32xf32>
    %cst_169 = arith.constant 1.000000e+00 : f32
    %519 = vector.broadcast %cst_169 : f32 to vector<8x32xf32>
    %520 = arith.subf %519, %511 : vector<8x32xf32>
    %521 = arith.mulf %520, %518 : vector<8x32xf32>
    %522 = arith.mulf %511, %460 : vector<8x32xf32>
    %523 = arith.addf %521, %522 : vector<8x32xf32>
    %c0_170 = arith.constant 0 : index
    %c0_171 = arith.constant 0 : index
    %524 = vector.load %arg14[%c0_170, %c0_171] : memref<8x128xf32, #tpu.memory_space<vmem>>, vector<8x128xf32>
    %525 = arith.truncf %523 : vector<8x32xf32> to vector<8x32xbf16>
    %526 = arith.index_cast %c6_i32_160 : i32 to index
    %c0_172 = arith.constant 0 : index
    %c0_173 = arith.constant 0 : index
    %527 = vector.load %arg10[%526, %c0_172, %c0_173] : memref<8x32x128xbf16, #tpu.memory_space<vmem>>, vector<1x32x128xbf16>
    %528 = vector.shape_cast %527 : vector<1x32x128xbf16> to vector<32x128xbf16>
    %cst_174 = arith.constant dense<0.000000e+00> : vector<8x128xf32>
    %529 = tpu.matmul %525, %528, %cst_174 {dimension_numbers = #tpu.dot_dimension_numbers<[1], [0], [0], [1], [0, 0, 1, 1], [], []>} : vector<8x32xbf16>, vector<32x128xbf16>, vector<8x128xf32> -> vector<8x128xf32>
    %530 = arith.addf %524, %529 : vector<8x128xf32>
    %c0_175 = arith.constant 0 : index
    %c0_176 = arith.constant 0 : index
    %531 = vector.load %arg14[%c0_175, %c0_176] : memref<8x128xf32, #tpu.memory_space<vmem>>, vector<8x128xf32>
    tpu.vector_store %arg14[%c0_175, %c0_176], %530 {strides = array<i32>} : memref<8x128xf32, #tpu.memory_space<vmem>>, vector<8x128xf32>,
    %c7_i32_177 = arith.constant 7 : i32
    %532 = arith.index_cast %c7_i32_177 : i32 to index
    %c0_178 = arith.constant 0 : index
    %c0_179 = arith.constant 0 : index
    %533 = vector.load %arg13[%532, %c0_178, %c0_179] : memref<8x8x96xf32, #tpu.memory_space<vmem>>, vector<1x8x96xf32>
    %534 = vector.shape_cast %533 : vector<1x8x96xf32> to vector<8x96xf32>
    %535 = arith.truncf %495 : vector<8x32xf32> to vector<8x32xbf16>
    %cst_180 = arith.constant dense<0.000000e+00> : vector<8x96xf32>
    %536 = tpu.matmul %535, %82, %cst_180 {dimension_numbers = #tpu.dot_dimension_numbers<[1], [0], [0], [1], [0, 0, 1, 1], [], []>} : vector<8x32xbf16>, vector<32x96xbf16>, vector<8x96xf32> -> vector<8x96xf32>
    %537 = vector.extract_strided_slice %534 {offsets = [0, 0], sizes = [8, 64], strides = [1, 1]} : vector<8x96xf32> to vector<8x64xf32>
    %538 = vector.extract_strided_slice %536 {offsets = [0, 0], sizes = [8, 64], strides = [1, 1]} : vector<8x96xf32> to vector<8x64xf32>
    %539 = arith.addf %537, %538 : vector<8x64xf32>
    %540 = arith.negf %539 : vector<8x64xf32>
    %541 = math.exp %540 : vector<8x64xf32>
    %cst_181 = arith.constant 1.000000e+00 : f32
    %542 = vector.broadcast %cst_181 : f32 to vector<8x64xf32>
    %543 = arith.addf %542, %541 : vector<8x64xf32>
    %544 = arith.divf %542, %543 : vector<8x64xf32>
    %545 = vector.extract_strided_slice %544 {offsets = [0, 0], sizes = [8, 32], strides = [1, 1]} : vector<8x64xf32> to vector<8x32xf32>
    %546 = vector.extract_strided_slice %544 {offsets = [0, 32], sizes = [8, 32], strides = [1, 1]} : vector<8x64xf32> to vector<8x32xf32>
    %547 = vector.extract_strided_slice %534 {offsets = [0, 64], sizes = [8, 32], strides = [1, 1]} : vector<8x96xf32> to vector<8x32xf32>
    %548 = vector.extract_strided_slice %536 {offsets = [0, 64], sizes = [8, 32], strides = [1, 1]} : vector<8x96xf32> to vector<8x32xf32>
    %549 = vector.broadcast %83 : vector<1x32xf32> to vector<8x32xf32>
    %550 = arith.addf %548, %549 : vector<8x32xf32>
    %551 = arith.mulf %545, %550 : vector<8x32xf32>
    %552 = arith.addf %547, %551 : vector<8x32xf32>
    %553 = math.tanh %552 : vector<8x32xf32>
    %cst_182 = arith.constant 1.000000e+00 : f32
    %554 = vector.broadcast %cst_182 : f32 to vector<8x32xf32>
    %555 = arith.subf %554, %546 : vector<8x32xf32>
    %556 = arith.mulf %555, %553 : vector<8x32xf32>
    %557 = arith.mulf %546, %495 : vector<8x32xf32>
    %558 = arith.addf %556, %557 : vector<8x32xf32>
    %559 = arith.truncf %558 : vector<8x32xf32> to vector<8x32xbf16>
    %cst_183 = arith.constant dense<0.000000e+00> : vector<8x96xf32>
    %560 = tpu.matmul %559, %84, %cst_183 {dimension_numbers = #tpu.dot_dimension_numbers<[1], [0], [0], [1], [0, 0, 1, 1], [], []>} : vector<8x32xbf16>, vector<32x96xbf16>, vector<8x96xf32> -> vector<8x96xf32>
    %561 = vector.broadcast %85 : vector<1x96xf32> to vector<8x96xf32>
    %562 = arith.addf %560, %561 : vector<8x96xf32>
    %563 = arith.truncf %523 : vector<8x32xf32> to vector<8x32xbf16>
    %cst_184 = arith.constant dense<0.000000e+00> : vector<8x96xf32>
    %564 = tpu.matmul %563, %86, %cst_184 {dimension_numbers = #tpu.dot_dimension_numbers<[1], [0], [0], [1], [0, 0, 1, 1], [], []>} : vector<8x32xbf16>, vector<32x96xbf16>, vector<8x96xf32> -> vector<8x96xf32>
    %565 = vector.extract_strided_slice %562 {offsets = [0, 0], sizes = [8, 64], strides = [1, 1]} : vector<8x96xf32> to vector<8x64xf32>
    %566 = vector.extract_strided_slice %564 {offsets = [0, 0], sizes = [8, 64], strides = [1, 1]} : vector<8x96xf32> to vector<8x64xf32>
    %567 = arith.addf %565, %566 : vector<8x64xf32>
    %568 = arith.negf %567 : vector<8x64xf32>
    %569 = math.exp %568 : vector<8x64xf32>
    %cst_185 = arith.constant 1.000000e+00 : f32
    %570 = vector.broadcast %cst_185 : f32 to vector<8x64xf32>
    %571 = arith.addf %570, %569 : vector<8x64xf32>
    %572 = arith.divf %570, %571 : vector<8x64xf32>
    %573 = vector.extract_strided_slice %572 {offsets = [0, 0], sizes = [8, 32], strides = [1, 1]} : vector<8x64xf32> to vector<8x32xf32>
    %574 = vector.extract_strided_slice %572 {offsets = [0, 32], sizes = [8, 32], strides = [1, 1]} : vector<8x64xf32> to vector<8x32xf32>
    %575 = vector.extract_strided_slice %562 {offsets = [0, 64], sizes = [8, 32], strides = [1, 1]} : vector<8x96xf32> to vector<8x32xf32>
    %576 = vector.extract_strided_slice %564 {offsets = [0, 64], sizes = [8, 32], strides = [1, 1]} : vector<8x96xf32> to vector<8x32xf32>
    %577 = vector.broadcast %87 : vector<1x32xf32> to vector<8x32xf32>
    %578 = arith.addf %576, %577 : vector<8x32xf32>
    %579 = arith.mulf %573, %578 : vector<8x32xf32>
    %580 = arith.addf %575, %579 : vector<8x32xf32>
    %581 = math.tanh %580 : vector<8x32xf32>
    %cst_186 = arith.constant 1.000000e+00 : f32
    %582 = vector.broadcast %cst_186 : f32 to vector<8x32xf32>
    %583 = arith.subf %582, %574 : vector<8x32xf32>
    %584 = arith.mulf %583, %581 : vector<8x32xf32>
    %585 = arith.mulf %574, %523 : vector<8x32xf32>
    %586 = arith.addf %584, %585 : vector<8x32xf32>
    %c0_187 = arith.constant 0 : index
    %c0_188 = arith.constant 0 : index
    %587 = vector.load %arg14[%c0_187, %c0_188] : memref<8x128xf32, #tpu.memory_space<vmem>>, vector<8x128xf32>
    %588 = arith.truncf %586 : vector<8x32xf32> to vector<8x32xbf16>
    %589 = arith.index_cast %c7_i32_177 : i32 to index
    %c0_189 = arith.constant 0 : index
    %c0_190 = arith.constant 0 : index
    %590 = vector.load %arg10[%589, %c0_189, %c0_190] : memref<8x32x128xbf16, #tpu.memory_space<vmem>>, vector<1x32x128xbf16>
    %591 = vector.shape_cast %590 : vector<1x32x128xbf16> to vector<32x128xbf16>
    %cst_191 = arith.constant dense<0.000000e+00> : vector<8x128xf32>
    %592 = tpu.matmul %588, %591, %cst_191 {dimension_numbers = #tpu.dot_dimension_numbers<[1], [0], [0], [1], [0, 0, 1, 1], [], []>} : vector<8x32xbf16>, vector<32x128xbf16>, vector<8x128xf32> -> vector<8x128xf32>
    %593 = arith.addf %587, %592 : vector<8x128xf32>
    %c0_192 = arith.constant 0 : index
    %c0_193 = arith.constant 0 : index
    %594 = vector.load %arg14[%c0_192, %c0_193] : memref<8x128xf32, #tpu.memory_space<vmem>>, vector<8x128xf32>
    tpu.vector_store %arg14[%c0_192, %c0_193], %593 {strides = array<i32>} : memref<8x128xf32, #tpu.memory_space<vmem>>, vector<8x128xf32>,
    %c8_i32_194 = arith.constant 8 : i32
    %c0_195 = arith.constant 0 : index
    %c0_196 = arith.constant 0 : index
    %595 = vector.load %arg14[%c0_195, %c0_196] : memref<8x128xf32, #tpu.memory_space<vmem>>, vector<8x128xf32>
    %c0_197 = arith.constant 0 : index
    %c0_198 = arith.constant 0 : index
    %596 = vector.load %arg11[%c0_197, %c0_198] : memref<1x128xf32, #tpu.memory_space<vmem>>, vector<1x128xf32>
    %597 = vector.broadcast %596 : vector<1x128xf32> to vector<8x128xf32>
    %598 = arith.addf %595, %597 : vector<8x128xf32>
    %c0_199 = arith.constant 0 : index
    %c0_200 = arith.constant 0 : index
    %599 = vector.load %arg12[%c0_199, %c0_200] : memref<8x128xf32, #tpu.memory_space<vmem>>, vector<8x128xf32>
    tpu.vector_store %arg12[%c0_199, %c0_200], %598 {strides = array<i32>} : memref<8x128xf32, #tpu.memory_space<vmem>>, vector<8x128xf32>,
    return
  }
  func.func @transform_0(%arg0: i32) -> (i32, i32, i32) {
    %c0_i32 = arith.constant 0 : i32
    %c0_i32_0 = arith.constant 0 : i32
    %c0_i32_1 = arith.constant 0 : i32
    return %c0_i32, %arg0, %c0_i32_0 : i32, i32, i32
  }
  func.func @transform_1(%arg0: i32) -> (i32, i32) {
    %c0_i32 = arith.constant 0 : i32
    %c0_i32_0 = arith.constant 0 : i32
    %c0_i32_1 = arith.constant 0 : i32
    return %c0_i32, %c0_i32_0 : i32, i32
  }
  func.func @transform_2(%arg0: i32) -> (i32, i32) {
    %c0_i32 = arith.constant 0 : i32
    %c0_i32_0 = arith.constant 0 : i32
    %c0_i32_1 = arith.constant 0 : i32
    return %c0_i32, %c0_i32_0 : i32, i32
  }
  func.func @transform_3(%arg0: i32) -> (i32, i32) {
    %c0_i32 = arith.constant 0 : i32
    %c0_i32_0 = arith.constant 0 : i32
    %c0_i32_1 = arith.constant 0 : i32
    return %c0_i32, %c0_i32_0 : i32, i32
  }
  func.func @transform_4(%arg0: i32) -> (i32, i32) {
    %c0_i32 = arith.constant 0 : i32
    %c0_i32_0 = arith.constant 0 : i32
    %c0_i32_1 = arith.constant 0 : i32
    return %c0_i32, %c0_i32_0 : i32, i32
  }
  func.func @transform_5(%arg0: i32) -> (i32, i32) {
    %c0_i32 = arith.constant 0 : i32
    %c0_i32_0 = arith.constant 0 : i32
    %c0_i32_1 = arith.constant 0 : i32
    return %c0_i32, %c0_i32_0 : i32, i32
  }
  func.func @transform_6(%arg0: i32) -> (i32, i32) {
    %c0_i32 = arith.constant 0 : i32
    %c0_i32_0 = arith.constant 0 : i32
    %c0_i32_1 = arith.constant 0 : i32
    return %c0_i32, %c0_i32_0 : i32, i32
  }
  func.func @transform_7(%arg0: i32) -> (i32, i32) {
    %c0_i32 = arith.constant 0 : i32
    %c0_i32_0 = arith.constant 0 : i32
    %c0_i32_1 = arith.constant 0 : i32
    return %c0_i32, %c0_i32_0 : i32, i32
  }
  func.func @transform_8(%arg0: i32) -> (i32, i32) {
    %c0_i32 = arith.constant 0 : i32
    %c0_i32_0 = arith.constant 0 : i32
    %c0_i32_1 = arith.constant 0 : i32
    return %c0_i32, %c0_i32_0 : i32, i32
  }
  func.func @transform_9(%arg0: i32) -> (i32, i32, i32) {
    %c0_i32 = arith.constant 0 : i32
    %c0_i32_0 = arith.constant 0 : i32
    %c0_i32_1 = arith.constant 0 : i32
    %c0_i32_2 = arith.constant 0 : i32
    return %c0_i32, %c0_i32_0, %c0_i32_1 : i32, i32, i32
  }
  func.func @transform_10(%arg0: i32) -> (i32, i32) {
    %c0_i32 = arith.constant 0 : i32
    %c0_i32_0 = arith.constant 0 : i32
    %c0_i32_1 = arith.constant 0 : i32
    return %c0_i32, %c0_i32_0 : i32, i32
  }
  func.func @transform_11(%arg0: i32) -> (i32, i32) {
    %c0_i32 = arith.constant 0 : i32
    %c0_i32_0 = arith.constant 0 : i32
    return %arg0, %c0_i32 : i32, i32
  }
}

</mosaic_0001>

<bundles_post_ra>
// kernel: rnn_forward.1
= control target key start
LH: loop header
LB: loop body
LE: loop exit
PB: predicated region body
PF: predicated region fallthrough
CT: control target
= control target key end

     0   :  { %16 = vsyncpa [#allocation5], 0  ;;  %s2471_s0 = inlined_call_operand.vmem [shape: bf16[8,8,28], index: 0, kind: input, shape index: {}]   ;;  %s2472_s1 = inlined_call_operand.vmem [shape: bf16[28,96], index: 1, kind: input, shape index: {}]   ;;  %s2473_s2 = inlined_call_operand.vmem [shape: f32[1,96], index: 2, kind: input, shape index: {}]   ;;  %s2474_s3 = inlined_call_operand.vmem [shape: bf16[32,96], index: 3, kind: input, shape index: {}]   ;;  %s2475_s4 = inlined_call_operand.vmem [shape: f32[1,32], index: 4, kind: input, shape index: {}]   ;;  %s2476_s5 = inlined_call_operand.vmem [shape: bf16[32,96], index: 5, kind: input, shape index: {}]   ;;  %s2477_s6 = inlined_call_operand.vmem [shape: f32[1,96], index: 6, kind: input, shape index: {}]   ;;  %s2478_s7 = inlined_call_operand.vmem [shape: bf16[32,96], index: 7, kind: input, shape index: {}]   ;;  %s2479_s8 = inlined_call_operand.vmem [shape: f32[1,32], index: 8, kind: input, shape index: {}]   ;;  %s2480_s9 = inlined_call_operand.hbm [shape: bf16[8,32,128], index: 9, kind: input, shape index: {}]   ;;  %s2481_s10 = inlined_call_operand.vmem [shape: f32[1,128], index: 10, kind: input, shape index: {}]   ;;  %s2482_s11 = inlined_call_operand.hbm [shape: f32[8,128], index: 11, kind: output, shape index: {}]  }
   0x1   :  { %17 = vsyncpa [#allocation6], 0  ;;  %s40_s19 = sshll.u32 %s2480_s9, 4  ;;  %s2014_s20 = smov [#allocation4]   ;;  %s41_s19 = int_to_ptr.hbm [resolvable:$true] %s40_s19 }
   0x2   :  { %s42_s21 = sshll.u32 %s2014_s20, 4  ;;  %s2015_s22 = smov 64   ;;  %s43_s21 = int_to_ptr.vmem [resolvable:$true] %s42_s21 }
   0x3   :  { %s2016_s23 = smov 4  }
   0x4   :  { %48 = dma.hbm_to_vmem [thread:$0]  %s41_s19, 2048, %s43_s21, [#allocation5], %s2015_s22, %s2015_s22, %s2016_s23  }
   0x5   :  { %2010 = dma.done.wait [#allocation5], 2048  }
   0x6   :  { %2011 = vsyncadd [#allocation5], 4294965248  ;;  %v1673_v0 = vld [vmem:[%s2472_s1 + $0x8] sm:$0xf]  ;;  %v1825_v1 = vld [vmem:[%s2472_s1 + $0x8] sm:$0x30] }
   0x7   :  { %vm80_vm0 = vcmask 1045504   ;;  %v1674_v2 = vor.u32 %v1825_v1, %v1673_v0  ;;  %v1824_v4 = vld [vmem:[%s2472_s1] sm:$0xff]  ;;  %vm76_vm1 = vcmask 228352   ;;  %v2100_v6 = vld [vmem:[%s2474_s3 + $0x8] sm:$0xff]  ;;  %v1682_v9 = vld [vmem:[%s2471_s0 + $0x10] sm:$0xf] }
   0x8   :  { %v61_v5 = vld [vmem:[%s2471_s0] sm:$0xf]  ;;  %v2017_v10 = vmov 0   ;;  %vm97_vm2 = vcmask 785408   ;;  %v1678_v39 = vld [vmem:[%s2471_s0 + $0x8] sm:$0xf] }
   0x9   :  { %v82_v3 = vsel %vm80_vm0, %v1674_v2, 0  ;;  %v1854_v7 = vld [vmem:[%s2475_s4] ss:$0 sm:$0xff]  ;;  %v2142_v40 = vld [vmem:[%s2478_s7 + $0x8] sm:$0xff]  ;;  %v1686_v41 = vld [vmem:[%s2471_s0 + $0x18] sm:$0xf] }
   0xa   :  { %90 = vmatpush.bf16.msra.mxu0 %v82_v3  ;;  %130 = vmatpush.bf16.msra.mxu2 %v82_v3  ;;  %v2111_v8 = vld [vmem:[%s2474_s3] sm:$0xff]  ;;  %s2018_s26 = smov 96   ;;  %v2167_v47 = vld [vmem:[%s2476_s5 + $0x8] sm:$0xff]  ;;  %v1684_v49 = vld [vmem:[%s2471_s0 + $0x14] sm:$0xf]  ;;  %vm268_vm7 = vcmask 261120  }
   0xb   :  { %110 = vmatpush.bf16.msra.mxu1 %v82_v3  ;;  %150 = vmatpush.bf16.msra.mxu3 %v82_v3  ;;  %v2125_v11 = vld [vmem:[%s2473_s2] ss:$0 sm:$0xff]  ;;  %v1676_v46 = vld [vmem:[%s2471_s0 + $0x4] sm:$0xf]  ;;  %s1657_s16 = sshll.u32 %s2482_s11, 4  ;;  %s1658_s16 = int_to_ptr.hbm [resolvable:$true] %s1657_s16 }
   0xc   :  { %307 = vrot.lane.b32.xlu0 %v1854_v7, %s2015_s22  ;;  %v2154_v45 = vld [vmem:[%s2478_s7] sm:$0xff] }
   0xd   :  { %v2174_v48 = vld [vmem:[%s2476_s5] sm:$0xff] }
   0xe   :  { %91 = vmatpush.bf16.msra.mxu0 %v1824_v4  ;;  %131 = vmatpush.bf16.msra.mxu2 %v1824_v4  ;;  %v1856_v56 = vld [vmem:[%s2479_s8] ss:$0 sm:$0xff] }
   0xf   :  { %111 = vmatpush.bf16.msra.mxu1 %v1824_v4  ;;  %151 = vmatpush.bf16.msra.mxu3 %v1824_v4 }
  0x11   :  { %1675 = vmatmul.msk.bf16.vlgmr.msra.gmra.mxu0 %vm76_vm1, %v61_v5  ;;  %1679 = vmatmul.msk.bf16.vlgmr.msra.gmra.mxu2 %vm76_vm1, %v1678_v39 }
  0x12   :  { %170 = vmatpush.bf16.msrb.mxu0 %v82_v3  ;;  %210 = vmatpush.bf16.msrb.mxu2 %v82_v3 }
  0x13   :  { %190 = vmatpush.bf16.msrb.mxu1 %v82_v3  ;;  %230 = vmatpush.bf16.msrb.mxu3 %v82_v3 }
  0x14   :  { %1677 = vmatmul.msk.bf16.vlgmr.msra.gmra.mxu1 %vm76_vm1, %v1676_v46 }
  0x16   :  { %171 = vmatpush.bf16.msrb.mxu0 %v1824_v4  ;;  %211 = vmatpush.bf16.msrb.mxu2 %v1824_v4 }
  0x17   :  { %191 = vmatpush.bf16.msrb.mxu1 %v1824_v4  ;;  %231 = vmatpush.bf16.msrb.mxu3 %v1824_v4 }
  0x1a   :  { %278 = vmatpush.bf16.msra.mxu0 %v2100_v6  ;;  %383 = vmatpush.bf16.msra.mxu2 %v2142_v40 }
  0x1b   :  { %358 = vmatpush.bf16.msra.mxu1 %v2167_v47 }
  0x1e   :  { %279 = vmatpush.bf16.msra.mxu0 %v2111_v8  ;;  %384 = vmatpush.bf16.msra.mxu2 %v2154_v45 }
  0x1f   :  { %359 = vmatpush.bf16.msra.mxu1 %v2174_v48 }
  0x21   :  { %1683 = vmatmul.msk.bf16.vlgmr.msrb.gmra.mxu0 %vm76_vm1, %v1682_v9  ;;  %1687 = vmatmul.msk.bf16.vlgmr.msrb.gmra.mxu2 %vm76_vm1, %v1686_v41 }
  0x22   :  { %481 = vmatpush.bf16.msrb.mxu0 %v2100_v6  ;;  %554 = vmatpush.bf16.msrb.mxu2 %v2142_v40 }
  0x24   :  { %1685 = vmatmul.msk.bf16.vlgmr.msrb.gmra.mxu1 %vm76_vm1, %v1684_v49 }
  0x25   :  { %541 = vmatpush.bf16.msrb.mxu1 %v2167_v47 }
  0x26   :  { %482 = vmatpush.bf16.msrb.mxu0 %v2111_v8  ;;  %555 = vmatpush.bf16.msrb.mxu2 %v2154_v45 }
  0x29   :  { %542 = vmatpush.bf16.msrb.mxu1 %v2174_v48 }
  0x31   :  { %280 = vmatmul.bf16.vlgmr.msra.gmra.mxu0 %v2017_v10  ;;  %385 = vmatmul.bf16.vlgmr.msra.gmra.mxu2 %v2017_v10 }
  0x32   :  { %648 = vmatpush.bf16.msra.mxu0 %v2100_v6  ;;  %721 = vmatpush.bf16.msra.mxu2 %v2142_v40 }
  0x36   :  { %649 = vmatpush.bf16.msra.mxu0 %v2111_v8  ;;  %722 = vmatpush.bf16.msra.mxu2 %v2154_v45 }
  0x7e   :  { %v2131_v18 = vpop.permute.xlu0 %307 }
  0x8e   :  { %v93_v12 = vpop.f32.mrf.mxu0 }
  0x8f   :  { %v94_v13 = vadd.f32 %v2125_v11, %v93_v12 }
  0x91   :  { %98 = vst.msk [vmem:[#allocation2] sm:$0xff] %vm97_vm2, %v94_v13  ;;  %v113_v3 = vpop.f32.mrf.mxu1  ;;  %v2213_v13 = vld [vmem:[%s2477_s6] ss:$0 sm:$0xff] }
  0x92   :  { %v114_v4 = vadd.f32 %v2125_v11, %v113_v3 }
  0x94   :  { %v133_v57 = vpop.f32.mrf.mxu2  ;;  %118 = vst.msk [vmem:[#allocation2 + $0x8] sm:$0xff] %vm97_vm2, %v114_v4 }
  0x95   :  { %v134_v58 = vadd.f32 %v2125_v11, %v133_v57 }
  0x96   :  { %v95_v14 = vpop.f32.mrf.mxu0 }
  0x97   :  { %138 = vst.msk [vmem:[#allocation2 + $0x10] sm:$0xff] %vm97_vm2, %v134_v58 }
  0x98   :  { %v255_v22 = vld [vmem:[#allocation2] sm:$0xff] }
  0x99   :  { %v115_v7 = vpop.f32.mrf.mxu1 }
  0x9c   :  { %v135_v59 = vpop.f32.mrf.mxu2 }
  0x9e   :  { %v173_v15 = vpop.f32.mrf.mxu0 }
  0x9f   :  { %v174_v16 = vadd.f32 %v2125_v11, %v173_v15 }
  0xa1   :  { %178 = vst.msk [vmem:[#allocation2 + $0x20] sm:$0xff] %vm97_vm2, %v174_v16  ;;  %v193_v9 = vpop.f32.mrf.mxu1 }
  0xa2   :  { %v194_v10 = vadd.f32 %v2125_v11, %v193_v9 }
  0xa4   :  { %v213_v60 = vpop.f32.mrf.mxu2  ;;  %198 = vst.msk [vmem:[#allocation2 + $0x28] sm:$0xff] %vm97_vm2, %v194_v10  ;;  %v1680_v10 = vld [vmem:[%s2471_s0 + $0xc] sm:$0xf] }
  0xa5   :  { %v214_v61 = vadd.f32 %v2125_v11, %v213_v60  ;;  %1681 = vmatmul.msk.bf16.vlgmr.msra.gmra.mxu3 %vm76_vm1, %v1680_v10 }
  0xa6   :  { %v175_v17 = vpop.f32.mrf.mxu0 }
  0xa7   :  { %218 = vst.msk [vmem:[#allocation2 + $0x30] sm:$0xff] %vm97_vm2, %v214_v61 }
  0xa9   :  { %v195_v12 = vpop.f32.mrf.mxu1 }
  0xaa   :  { %v1833_v12 = vld [vmem:[#allocation4 + $0x8] sm:$0xff] }
  0xab   :  { %465 = vmatpush.bf16.msra.mxu3 %v1833_v12 }
  0xac   :  { %v215_v62 = vpop.f32.mrf.mxu2 }
  0xae   :  { %v281_v19 = vpop.f32.mrf.mxu0 }
  0xaf   :  { %v310_v20 = vadd.f32 %v2131_v18, %v281_v19  ;;  %v285_v23 = vadd.f32 %v281_v19, %v255_v22 }
  0xb1   :  { %312 = vrot.lane.b32.xlu0 %v310_v20, %s2015_s22  ;;  %v1698_v24 = vmul.f32 -1.442695, %v285_v23 }
  0xb3   :  { %1859 = vpow2.f32 %v1698_v24 }
  0xb4   :  { %v386_v1 = vpop.f32.mrf.mxu2 }
  0xb6   :  { %v283_v21 = vpop.f32.mrf.mxu0 }
  0xb9   :  { %v1860_v25 = vpop.eup %1859 }
  0xba   :  { %v289_v26 = vadd.f32 1.0, %v1860_v25 }
  0xbc   :  { %1861 = vrcp.f32 %v289_v26  ;;  %v301_v32 = vand.u32 2147483648, %v289_v26  ;;  %vm295_vm4 = vweird.f32 %v289_v26  ;;  %v299_v33 = vand.u32 2147483647, %v289_v26  ;;  %v388_v5 = vpop.f32.mrf.mxu2 }
  0xbe   :  { %v302_v35 = vor.u32 1.1754944e-38, %v301_v32  ;;  %vm300_vm6 = vcmp.eq.f32.partialorder %v299_v33, 8.507059e+37 }
  0xc2   :  { %v1862_v27 = vpop.eup %1861 }
  0xc3   :  { %v291_v28 = vmul.f32 %v1862_v27, %v289_v26  ;;  %vm296_vm3 = vweird.f32 %v1862_v27 }
  0xc4   :  { %vm297_vm5 = vmor %vm295_vm4, %vm296_vm3 }
  0xc5   :  { %v292_v29 = vsub.f32 1.0, %v291_v28 }
  0xc7   :  { %v293_v30 = vmul.f32 %v1862_v27, %v292_v29 }
  0xc9   :  { %v294_v31 = vadd.f32 %v1862_v27, %v293_v30 }
  0xcb   :  { %v298_v34 = vsel %vm297_vm5, %v1862_v27, %v294_v31 }
  0xcc   :  { %v303_v37 = vsel %vm300_vm6, %v302_v35, %v298_v34 }
  0xcd   :  { %v322_v50 = vsub.f32 1.0, %v303_v37  ;;  %v328_v52 = vmul.f32 0.0, %v303_v37 }
 0x123   :  { %v313_v36 = vpop.permute.xlu0 %312 }
 0x124   :  { %v315_v38 = vmul.f32 %v313_v36, %v303_v37  ;;  %v474_v37 = vld [vmem:[#allocation2 + $0x8] sm:$0xff] }
 0x126   :  { %317 = vrot.lane.b32.xlu1 %v315_v38, %s2015_s22 }
 0x198   :  { %v318_v42 = vpop.permute.xlu1 %317 }
 0x199   :  { %v320_v43 = vadd.f32 %v318_v42, %v255_v22 }
 0x19b   :  { %1863 = vtanh.f32 %v320_v43 }
 0x1a1   :  { %v1864_v44 = vpop.eup %1863 }
 0x1a2   :  { %324 = vrot.lane.b32.xlu1 %v1864_v44, %s2018_s26 }
 0x214   :  { %v325_v51 = vpop.permute.xlu1 %324 }
 0x215   :  { %v327_v53 = vmul.f32 %v325_v51, %v322_v50 }
 0x217   :  { %v2182_v54 = vadd.f32 %v328_v52, %v327_v53 }
 0x219   :  { %v330_v55 = vpack.c.bf16 %v2182_v54, %v2182_v54 }
 0x21b   :  { %335 = vrot.lane.b32.xlu2 %v330_v55, %s2018_s26 }
 0x223   :  { %412 = vrot.lane.b32.xlu2 %v1856_v56, %s2015_s22 }
 0x275   :  { %v336_v63 = vpop.permute.xlu2 %335 }
 0x276   :  { %1707 = vmatmul.msk.bf16.vlgmr.msra.gmra.mxu1 %vm268_vm7, %v336_v63  ;;  %1726 = vmatmul.msk.bf16.vlgmr.msrb.gmra.mxu0 %vm268_vm7, %v336_v63 }
 0x277   :  { %708 = vmatpush.bf16.msra.mxu1 %v2167_v47  ;;  %815 = vmatpush.bf16.msrb.mxu0 %v2100_v6 }
 0x27b   :  { %709 = vmatpush.bf16.msra.mxu1 %v2174_v48  ;;  %816 = vmatpush.bf16.msrb.mxu0 %v2111_v8 }
 0x27d   :  { %v2202_v0 = vpop.permute.xlu2 %412 }
 0x27e   :  { %v415_v2 = vadd.f32 %v2202_v0, %v386_v1 }
 0x280   :  { %417 = vrot.lane.b32.xlu0 %v415_v2, %s2015_s22 }
 0x2f2   :  { %v418_v33 = vpop.permute.xlu0 %417 }
 0x2f3   :  { %v361_v14 = vpop.f32.mrf.mxu1  ;;  %v484_v15 = vpop.f32.mrf.mxu0 }
 0x2f4   :  { %v362_v16 = vadd.f32 %v2213_v13, %v361_v14  ;;  %v508_v17 = vadd.f32 %v484_v15, %v2131_v18  ;;  %v488_v38 = vadd.f32 %v484_v15, %v474_v37  ;;  %v1832_v14 = vld [vmem:[#allocation4] sm:$0xff]  ;;  %v1688_v15 = vld [vmem:[%s2471_s0 + $0x1c] sm:$0xf] }
 0x2f5   :  { %466 = vmatpush.bf16.msra.mxu3 %v1832_v14 }
 0x2f6   :  { %v390_v19 = vadd.f32 %v386_v1, %v362_v16  ;;  %510 = vrot.lane.b32.xlu1 %v508_v17, %s2015_s22  ;;  %v1727_v39 = vmul.f32 -1.442695, %v488_v38  ;;  %1689 = vmatmul.msk.bf16.vlgmr.msrb.gmra.mxu3 %vm76_vm1, %v1688_v15 }
 0x2f8   :  { %v1716_v20 = vmul.f32 -1.442695, %v390_v19 }
 0x2fa   :  { %1865 = vpow2.f32 %v1716_v20 }
 0x2fb   :  { %v363_v21 = vpop.f32.mrf.mxu1  ;;  %v486_v22 = vpop.f32.mrf.mxu0 }
 0x300   :  { %v1866_v23 = vpop.eup %1865 }
 0x301   :  { %v394_v24 = vadd.f32 1.0, %v1866_v23 }
 0x303   :  { %1867 = vrcp.f32 %v394_v24  ;;  %v406_v28 = vand.u32 2147483648, %v394_v24  ;;  %v404_v30 = vand.u32 2147483647, %v394_v24  ;;  %vm400_vm9 = vweird.f32 %v394_v24 }
 0x304   :  { %1869 = vpow2.f32 %v1727_v39 }
 0x305   :  { %v407_v32 = vor.u32 1.1754944e-38, %v406_v28  ;;  %vm405_vm11 = vcmp.eq.f32.partialorder %v404_v30, 8.507059e+37 }
 0x309   :  { %v1868_v25 = vpop.eup %1867 }
 0x30a   :  { %v396_v26 = vmul.f32 %v1868_v25, %v394_v24  ;;  %vm401_vm8 = vweird.f32 %v1868_v25  ;;  %v1870_v41 = vpop.eup %1869  ;;  %v153_v24 = vpop.f32.mrf.mxu3 }
 0x30b   :  { %vm402_vm10 = vmor %vm400_vm9, %vm401_vm8  ;;  %v492_v42 = vadd.f32 1.0, %v1870_v41 }
 0x30c   :  { %v397_v27 = vsub.f32 1.0, %v396_v26 }
 0x30d   :  { %1871 = vrcp.f32 %v492_v42  ;;  %v504_v51 = vand.u32 2147483648, %v492_v42  ;;  %vm498_vm13 = vweird.f32 %v492_v42  ;;  %v502_v52 = vand.u32 2147483647, %v492_v42 }
 0x30e   :  { %v398_v29 = vmul.f32 %v1868_v25, %v397_v27 }
 0x30f   :  { %v505_v55 = vor.u32 1.1754944e-38, %v504_v51  ;;  %vm503_vm15 = vcmp.eq.f32.partialorder %v502_v52, 8.507059e+37 }
 0x310   :  { %v399_v31 = vadd.f32 %v1868_v25, %v398_v29 }
 0x312   :  { %v403_v34 = vsel %vm402_vm10, %v1868_v25, %v399_v31  ;;  %v155_v25 = vpop.f32.mrf.mxu3 }
 0x313   :  { %v408_v35 = vsel %vm405_vm11, %v407_v32, %v403_v34  ;;  %v1872_v43 = vpop.eup %1871 }
 0x314   :  { %v420_v36 = vmul.f32 %v418_v33, %v408_v35  ;;  %v494_v44 = vmul.f32 %v1872_v43, %v492_v42  ;;  %vm499_vm12 = vweird.f32 %v1872_v43  ;;  %v427_v2 = vsub.f32 1.0, %v408_v35 }
 0x315   :  { %vm500_vm14 = vmor %vm498_vm13, %vm499_vm12  ;;  %v433_v4 = vmul.f32 0.0, %v408_v35 }
 0x316   :  { %422 = vrot.lane.b32.xlu2 %v420_v36, %s2015_s22  ;;  %v495_v46 = vsub.f32 1.0, %v494_v44 }
 0x318   :  { %v496_v49 = vmul.f32 %v1872_v43, %v495_v46 }
 0x31a   :  { %v497_v50 = vadd.f32 %v1872_v43, %v496_v49 }
 0x31c   :  { %v501_v53 = vsel %vm500_vm14, %v1872_v43, %v497_v50 }
 0x31d   :  { %v506_v57 = vsel %vm503_vm15, %v505_v55, %v501_v53 }
 0x31e   :  { %v526_v19 = vmul.f32 %v506_v57, %v2182_v54  ;;  %v154_v54 = vadd.f32 %v2125_v11, %v153_v24 }
 0x320   :  { %158 = vst.msk [vmem:[#allocation2 + $0x18] sm:$0xff] %vm97_vm2, %v154_v54 }
 0x368   :  { %v511_v56 = vpop.permute.xlu1 %510 }
 0x369   :  { %v513_v58 = vmul.f32 %v511_v56, %v506_v57 }
 0x36b   :  { %515 = vrot.lane.b32.xlu0 %v513_v58, %s2015_s22 }
 0x370   :  { %v423_v59 = vpop.permute.xlu2 %422 }
 0x371   :  { %v425_v60 = vadd.f32 %v423_v59, %v362_v16  ;;  %v520_v16 = vsub.f32 1.0, %v506_v57 }
 0x373   :  { %1873 = vtanh.f32 %v425_v60 }
 0x379   :  { %v1874_v61 = vpop.eup %1873  ;;  %v233_v26 = vpop.f32.mrf.mxu3 }
 0x37a   :  { %429 = vrot.lane.b32.xlu1 %v1874_v61, %s2018_s26  ;;  %v234_v27 = vadd.f32 %v2125_v11, %v233_v26  ;;  %v641_v61 = vld [vmem:[#allocation2 + $0x10] sm:$0xff] }
 0x37c   :  { %238 = vst.msk [vmem:[#allocation2 + $0x38] sm:$0xff] %vm97_vm2, %v234_v27 }
 0x381   :  { %v235_v29 = vpop.f32.mrf.mxu3 }
 0x3dd   :  { %v516_v62 = vpop.permute.xlu0 %515 }
 0x3de   :  { %v518_v63 = vadd.f32 %v516_v62, %v474_v37 }
 0x3e0   :  { %1875 = vtanh.f32 %v518_v63 }
 0x3e6   :  { %v1876_v1 = vpop.eup %1875 }
 0x3e7   :  { %522 = vrot.lane.b32.xlu2 %v1876_v1, %s2018_s26 }
 0x3ec   :  { %v430_v3 = vpop.permute.xlu1 %429 }
 0x3ed   :  { %v432_v5 = vmul.f32 %v430_v3, %v427_v2 }
 0x3ef   :  { %v2222_v7 = vadd.f32 %v433_v4, %v432_v5 }
 0x3f1   :  { %v436_v9 = vpack.c.bf16 %v2222_v7, %v2222_v7 }
 0x3f3   :  { %442 = vrot.lane.b32.xlu0 %v436_v9, %s2018_s26 }
 0x441   :  { %v523_v17 = vpop.permute.xlu2 %522 }
 0x442   :  { %v525_v20 = vmul.f32 %v523_v17, %v520_v16 }
 0x444   :  { %v2236_v21 = vadd.f32 %v526_v19, %v525_v20 }
 0x446   :  { %v528_v22 = vpack.c.bf16 %v2236_v21, %v2236_v21 }
 0x448   :  { %530 = vrot.lane.b32.xlu1 %v528_v22, %s2018_s26 }
 0x465   :  { %v443_v23 = vpop.permute.xlu0 %442 }
 0x466   :  { %1725 = vmatmul.msk.bf16.vlgmr.msra.gmra.mxu3 %vm268_vm7, %v443_v23  ;;  %1729 = vmatmul.msk.bf16.vlgmr.msrb.gmra.mxu2 %vm268_vm7, %v443_v23 }
 0x467   :  { %888 = vmatpush.bf16.msrb.mxu2 %v2142_v40 }
 0x46b   :  { %889 = vmatpush.bf16.msrb.mxu2 %v2154_v45 }
 0x4ba   :  { %v531_v28 = vpop.permute.xlu1 %530 }
 0x4bb   :  { %1728 = vmatmul.msk.bf16.vlgmr.msrb.gmra.mxu1 %vm268_vm7, %v531_v28  ;;  %1740 = vmatmul.msk.bf16.vlgmr.msra.gmra.mxu0 %vm268_vm7, %v531_v28 }
 0x4bc   :  { %875 = vmatpush.bf16.msrb.mxu1 %v2167_v47  ;;  %982 = vmatpush.bf16.msra.mxu0 %v2100_v6 }
 0x4c0   :  { %876 = vmatpush.bf16.msrb.mxu1 %v2174_v48  ;;  %983 = vmatpush.bf16.msra.mxu0 %v2111_v8 }
 0x4e9   :  { %v2255_v30 = vpop.f32.mrf.mxu3  ;;  %v557_v31 = vpop.f32.mrf.mxu2 }
 0x4ea   :  { %v581_v11 = vadd.f32 %v557_v31, %v2202_v0 }
 0x4ec   :  { %583 = vrot.lane.b32.xlu2 %v581_v11, %s2015_s22 }
 0x4f1   :  { %v470_v32 = vpop.f32.mrf.mxu3  ;;  %v559_v33 = vpop.f32.mrf.mxu2 }
 0x4f2   :  { %v1835_v33 = vld [vmem:[#allocation4 + $0x18] sm:$0xff] }
 0x4f3   :  { %632 = vmatpush.bf16.msrb.mxu3 %v1835_v33 }
 0x538   :  { %v544_v34 = vpop.f32.mrf.mxu1  ;;  %v651_v35 = vpop.f32.mrf.mxu0 }
 0x539   :  { %v545_v36 = vadd.f32 %v2213_v13, %v544_v34  ;;  %v675_v37 = vadd.f32 %v651_v35, %v2131_v18  ;;  %v655_v62 = vadd.f32 %v651_v35, %v641_v61  ;;  %v1834_v34 = vld [vmem:[#allocation4 + $0x10] sm:$0xff] }
 0x53a   :  { %633 = vmatpush.bf16.msrb.mxu3 %v1834_v34 }
 0x53b   :  { %v561_v38 = vadd.f32 %v557_v31, %v545_v36  ;;  %677 = vrot.lane.b32.xlu0 %v675_v37, %s2015_s22  ;;  %v1741_v63 = vmul.f32 -1.442695, %v655_v62 }
 0x53d   :  { %v1730_v39 = vmul.f32 -1.442695, %v561_v38 }
 0x53f   :  { %1877 = vpow2.f32 %v1730_v39 }
 0x540   :  { %v546_v41 = vpop.f32.mrf.mxu1  ;;  %v653_v42 = vpop.f32.mrf.mxu0 }
 0x545   :  { %v1878_v43 = vpop.eup %1877 }
 0x546   :  { %v565_v44 = vadd.f32 1.0, %v1878_v43  ;;  %v584_v58 = vpop.permute.xlu2 %583 }
 0x548   :  { %1879 = vrcp.f32 %v565_v44  ;;  %v577_v51 = vand.u32 2147483648, %v565_v44  ;;  %v575_v53 = vand.u32 2147483647, %v565_v44  ;;  %vm571_vm1 = vweird.f32 %v565_v44 }
 0x549   :  { %1881 = vpow2.f32 %v1741_v63 }
 0x54a   :  { %v578_v56 = vor.u32 1.1754944e-38, %v577_v51  ;;  %vm576_vm3 = vcmp.eq.f32.partialorder %v575_v53, 8.507059e+37 }
 0x54e   :  { %v1880_v46 = vpop.eup %1879 }
 0x54f   :  { %v567_v49 = vmul.f32 %v1880_v46, %v565_v44  ;;  %vm572_vm0 = vweird.f32 %v1880_v46  ;;  %v1882_v1 = vpop.eup %1881 }
 0x550   :  { %vm573_vm2 = vmor %vm571_vm1, %vm572_vm0  ;;  %v659_v2 = vadd.f32 1.0, %v1882_v1 }
 0x551   :  { %v568_v50 = vsub.f32 1.0, %v567_v49 }
 0x552   :  { %1883 = vrcp.f32 %v659_v2  ;;  %v671_v12 = vand.u32 2147483648, %v659_v2  ;;  %vm665_vm5 = vweird.f32 %v659_v2  ;;  %v669_v14 = vand.u32 2147483647, %v659_v2 }
 0x553   :  { %v569_v52 = vmul.f32 %v1880_v46, %v568_v50 }
 0x554   :  { %v672_v16 = vor.u32 1.1754944e-38, %v671_v12  ;;  %vm670_vm8 = vcmp.eq.f32.partialorder %v669_v14, 8.507059e+37 }
 0x555   :  { %v570_v55 = vadd.f32 %v1880_v46, %v569_v52 }
 0x557   :  { %v574_v57 = vsel %vm573_vm2, %v1880_v46, %v570_v55 }
 0x558   :  { %v579_v59 = vsel %vm576_vm3, %v578_v56, %v574_v57  ;;  %v1884_v3 = vpop.eup %1883 }
 0x559   :  { %v586_v60 = vmul.f32 %v584_v58, %v579_v59  ;;  %v661_v4 = vmul.f32 %v1884_v3, %v659_v2  ;;  %vm666_vm4 = vweird.f32 %v1884_v3  ;;  %v593_v27 = vsub.f32 1.0, %v579_v59 }
 0x55a   :  { %vm667_vm6 = vmor %vm665_vm5, %vm666_vm4  ;;  %v599_v29 = vmul.f32 %v579_v59, %v2222_v7 }
 0x55b   :  { %588 = vrot.lane.b32.xlu1 %v586_v60, %s2015_s22  ;;  %v662_v5 = vsub.f32 1.0, %v661_v4 }
 0x55d   :  { %v663_v9 = vmul.f32 %v1884_v3, %v662_v5 }
 0x55f   :  { %v664_v10 = vadd.f32 %v1884_v3, %v663_v9 }
 0x561   :  { %v668_v15 = vsel %vm667_vm6, %v1884_v3, %v664_v10 }
 0x562   :  { %v673_v17 = vsel %vm670_vm8, %v672_v16, %v668_v15  ;;  %v808_v15 = vld [vmem:[#allocation2 + $0x18] sm:$0xff] }
 0x563   :  { %v687_v35 = vsub.f32 1.0, %v673_v17  ;;  %v693_v37 = vmul.f32 %v673_v17, %v2236_v21 }
 0x5ad   :  { %v678_v19 = vpop.permute.xlu0 %677 }
 0x5ae   :  { %v680_v20 = vmul.f32 %v678_v19, %v673_v17 }
 0x5b0   :  { %682 = vrot.lane.b32.xlu2 %v680_v20, %s2015_s22 }
 0x5cd   :  { %v589_v22 = vpop.permute.xlu1 %588 }
 0x5ce   :  { %v591_v23 = vadd.f32 %v589_v22, %v545_v36 }
 0x5d0   :  { %1885 = vtanh.f32 %v591_v23 }
 0x5d6   :  { %v1886_v24 = vpop.eup %1885 }
 0x5d7   :  { %595 = vrot.lane.b32.xlu0 %v1886_v24, %s2018_s26 }
 0x60a   :  { %v683_v54 = vpop.permute.xlu2 %682 }
 0x60b   :  { %v685_v25 = vadd.f32 %v683_v54, %v641_v61 }
 0x60d   :  { %1887 = vtanh.f32 %v685_v25 }
 0x613   :  { %v1888_v26 = vpop.eup %1887 }
 0x614   :  { %689 = vrot.lane.b32.xlu1 %v1888_v26, %s2018_s26 }
 0x649   :  { %v596_v28 = vpop.permute.xlu0 %595 }
 0x64a   :  { %v598_v31 = vmul.f32 %v596_v28, %v593_v27 }
 0x64c   :  { %v2267_v11 = vadd.f32 %v599_v29, %v598_v31 }
 0x64e   :  { %v602_v32 = vpack.c.bf16 %v2267_v11, %v2267_v11 }
 0x650   :  { %609 = vrot.lane.b32.xlu2 %v602_v32, %s2018_s26 }
 0x686   :  { %v690_v36 = vpop.permute.xlu1 %689 }
 0x687   :  { %v692_v38 = vmul.f32 %v690_v36, %v687_v35 }
 0x689   :  { %v2273_v39 = vadd.f32 %v693_v37, %v692_v38 }
 0x68b   :  { %v695_v7 = vpack.c.bf16 %v2273_v39, %v2273_v39 }
 0x68d   :  { %697 = vrot.lane.b32.xlu0 %v695_v7, %s2018_s26 }
 0x6aa   :  { %v610_v41 = vpop.permute.xlu2 %609 }
 0x6ab   :  { %1739 = vmatmul.msk.bf16.vlgmr.msrb.gmra.mxu3 %vm268_vm7, %v610_v41  ;;  %1743 = vmatmul.msk.bf16.vlgmr.msra.gmra.mxu2 %vm268_vm7, %v610_v41 }
 0x6ac   :  { %1055 = vmatpush.bf16.msra.mxu2 %v2142_v40 }
 0x6b0   :  { %1056 = vmatpush.bf16.msra.mxu2 %v2154_v45 }
 0x6ff   :  { %v698_v42 = vpop.permute.xlu0 %697 }
 0x700   :  { %1742 = vmatmul.msk.bf16.vlgmr.msra.gmra.mxu1 %vm268_vm7, %v698_v42  ;;  %1754 = vmatmul.msk.bf16.vlgmr.msrb.gmra.mxu0 %vm268_vm7, %v698_v42 }
 0x701   :  { %1042 = vmatpush.bf16.msra.mxu1 %v2167_v47  ;;  %1149 = vmatpush.bf16.msrb.mxu0 %v2100_v6 }
 0x705   :  { %1043 = vmatpush.bf16.msra.mxu1 %v2174_v48  ;;  %1150 = vmatpush.bf16.msrb.mxu0 %v2111_v8 }
 0x72e   :  { %v2288_v21 = vpop.f32.mrf.mxu3  ;;  %v724_v43 = vpop.f32.mrf.mxu2 }
 0x72f   :  { %v748_v44 = vadd.f32 %v724_v43, %v2202_v0 }
 0x731   :  { %750 = vrot.lane.b32.xlu1 %v748_v44, %s2015_s22 }
 0x736   :  { %v637_v46 = vpop.f32.mrf.mxu3  ;;  %v726_v49 = vpop.f32.mrf.mxu2 }
 0x77d   :  { %v711_v50 = vpop.f32.mrf.mxu1  ;;  %v818_v51 = vpop.f32.mrf.mxu0 }
 0x77e   :  { %v712_v52 = vadd.f32 %v2213_v13, %v711_v50  ;;  %v842_v53 = vadd.f32 %v818_v51, %v2131_v18  ;;  %v822_v16 = vadd.f32 %v818_v51, %v808_v15  ;;  %v1837_v50 = vld [vmem:[#allocation4 + $0x28] sm:$0xff]  ;;  %v1836_v51 = vld [vmem:[#allocation4 + $0x20] sm:$0xff] }
 0x77f   :  { %799 = vmatpush.bf16.msra.mxu3 %v1837_v50 }
 0x780   :  { %v728_v55 = vadd.f32 %v724_v43, %v712_v52  ;;  %844 = vrot.lane.b32.xlu2 %v842_v53, %s2015_s22  ;;  %v1755_v17 = vmul.f32 -1.442695, %v822_v16 }
 0x782   :  { %v1744_v56 = vmul.f32 -1.442695, %v728_v55 }
 0x783   :  { %800 = vmatpush.bf16.msra.mxu3 %v1836_v51 }
 0x784   :  { %1889 = vpow2.f32 %v1744_v56 }
 0x785   :  { %v713_v57 = vpop.f32.mrf.mxu1  ;;  %v820_v58 = vpop.f32.mrf.mxu0 }
 0x78a   :  { %v1890_v59 = vpop.eup %1889 }
 0x78b   :  { %v732_v60 = vadd.f32 1.0, %v1890_v59 }
 0x78d   :  { %1891 = vrcp.f32 %v732_v60  ;;  %v744_v3 = vand.u32 2147483648, %v732_v60  ;;  %vm738_vm10 = vweird.f32 %v732_v60  ;;  %v742_v4 = vand.u32 2147483647, %v732_v60 }
 0x78e   :  { %1893 = vpow2.f32 %v1755_v17 }
 0x78f   :  { %v745_v9 = vor.u32 1.1754944e-38, %v744_v3  ;;  %vm743_vm12 = vcmp.eq.f32.partialorder %v742_v4, 8.507059e+37 }
 0x793   :  { %v1892_v61 = vpop.eup %1891 }
 0x794   :  { %v734_v62 = vmul.f32 %v1892_v61, %v732_v60  ;;  %vm739_vm9 = vweird.f32 %v1892_v61  ;;  %v1894_v19 = vpop.eup %1893 }
 0x795   :  { %vm740_vm11 = vmor %vm738_vm10, %vm739_vm9  ;;  %v826_v20 = vadd.f32 1.0, %v1894_v19 }
 0x796   :  { %v735_v63 = vsub.f32 1.0, %v734_v62 }
 0x797   :  { %1895 = vrcp.f32 %v826_v20  ;;  %v838_v26 = vand.u32 2147483648, %v826_v20  ;;  %vm832_vm14 = vweird.f32 %v826_v20  ;;  %v836_v27 = vand.u32 2147483647, %v826_v20 }
 0x798   :  { %v736_v1 = vmul.f32 %v1892_v61, %v735_v63 }
 0x799   :  { %v839_v29 = vor.u32 1.1754944e-38, %v838_v26  ;;  %vm837_vm0 = vcmp.eq.f32.partialorder %v836_v27, 8.507059e+37 }
 0x79a   :  { %v737_v2 = vadd.f32 %v1892_v61, %v736_v1 }
 0x79c   :  { %v741_v5 = vsel %vm740_vm11, %v1892_v61, %v737_v2 }
 0x79d   :  { %v746_v12 = vsel %vm743_vm12, %v745_v9, %v741_v5  ;;  %v1896_v22 = vpop.eup %1895 }
 0x79e   :  { %v828_v23 = vmul.f32 %v1896_v22, %v826_v20  ;;  %vm833_vm13 = vweird.f32 %v1896_v22  ;;  %v760_v41 = vsub.f32 1.0, %v746_v12  ;;  %v766_v43 = vmul.f32 %v746_v12, %v2267_v11 }
 0x79f   :  { %vm834_vm15 = vmor %vm832_vm14, %vm833_vm13 }
 0x7a0   :  { %v829_v24 = vsub.f32 1.0, %v828_v23 }
 0x7a2   :  { %v830_v54 = vmul.f32 %v1896_v22, %v829_v24 }
 0x7a3   :  { %v751_v10 = vpop.permute.xlu1 %750 }
 0x7a4   :  { %v753_v14 = vmul.f32 %v751_v10, %v746_v12  ;;  %v831_v25 = vadd.f32 %v1896_v22, %v830_v54  ;;  %v975_v54 = vld [vmem:[#allocation2 + $0x20] sm:$0xff] }
 0x7a6   :  { %755 = vrot.lane.b32.xlu0 %v753_v14, %s2015_s22  ;;  %v835_v28 = vsel %vm834_vm15, %v1896_v22, %v831_v25 }
 0x7a7   :  { %v840_v32 = vsel %vm837_vm0, %v839_v29, %v835_v28 }
 0x7a8   :  { %v860_v55 = vmul.f32 %v840_v32, %v2273_v39  ;;  %v639_v39 = vadd.f32 %v2288_v21, %v2255_v30 }
 0x7da   :  { %v845_v31 = vpop.permute.xlu2 %844 }
 0x7db   :  { %v847_v33 = vmul.f32 %v845_v31, %v840_v32 }
 0x7dd   :  { %849 = vrot.lane.b32.xlu1 %v847_v33, %s2015_s22 }
 0x818   :  { %v756_v34 = vpop.permute.xlu0 %755 }
 0x819   :  { %v758_v35 = vadd.f32 %v756_v34, %v712_v52  ;;  %v854_v52 = vsub.f32 1.0, %v840_v32 }
 0x81b   :  { %1897 = vtanh.f32 %v758_v35 }
 0x821   :  { %v1898_v36 = vpop.eup %1897 }
 0x822   :  { %762 = vrot.lane.b32.xlu2 %v1898_v36, %s2018_s26 }
 0x84f   :  { %v850_v37 = vpop.permute.xlu1 %849 }
 0x850   :  { %v852_v38 = vadd.f32 %v850_v37, %v808_v15 }
 0x852   :  { %1899 = vtanh.f32 %v852_v38 }
 0x858   :  { %v1900_v7 = vpop.eup %1899 }
 0x859   :  { %856 = vrot.lane.b32.xlu0 %v1900_v7, %s2018_s26 }
 0x87c   :  { %v763_v42 = vpop.permute.xlu2 %762 }
 0x87d   :  { %v765_v44 = vmul.f32 %v763_v42, %v760_v41 }
 0x87f   :  { %v2300_v46 = vadd.f32 %v766_v43, %v765_v44 }
 0x881   :  { %v769_v49 = vpack.c.bf16 %v2300_v46, %v2300_v46 }
 0x883   :  { %776 = vrot.lane.b32.xlu1 %v769_v49, %s2018_s26 }
 0x8cb   :  { %v857_v53 = vpop.permute.xlu0 %856 }
 0x8cc   :  { %v859_v56 = vmul.f32 %v857_v53, %v854_v52 }
 0x8ce   :  { %v2306_v57 = vadd.f32 %v860_v55, %v859_v56 }
 0x8d0   :  { %v862_v11 = vpack.c.bf16 %v2306_v57, %v2306_v57 }
 0x8d2   :  { %864 = vrot.lane.b32.xlu2 %v862_v11, %s2018_s26 }
 0x8f5   :  { %v777_v58 = vpop.permute.xlu1 %776 }
 0x8f6   :  { %1753 = vmatmul.msk.bf16.vlgmr.msra.gmra.mxu3 %vm268_vm7, %v777_v58  ;;  %1757 = vmatmul.msk.bf16.vlgmr.msrb.gmra.mxu2 %vm268_vm7, %v777_v58 }
 0x8f7   :  { %1222 = vmatpush.bf16.msrb.mxu2 %v2142_v40 }
 0x8fb   :  { %1223 = vmatpush.bf16.msrb.mxu2 %v2154_v45 }
 0x92c   :  { %v865_v59 = vpop.permute.xlu2 %864 }
 0x92d   :  { %1756 = vmatmul.msk.bf16.vlgmr.msrb.gmra.mxu1 %vm268_vm7, %v865_v59  ;;  %1768 = vmatmul.msk.bf16.vlgmr.msra.gmra.mxu0 %vm268_vm7, %v865_v59 }
 0x92e   :  { %1209 = vmatpush.bf16.msrb.mxu1 %v2167_v47  ;;  %1316 = vmatpush.bf16.msra.mxu0 %v2100_v6 }
 0x932   :  { %1210 = vmatpush.bf16.msrb.mxu1 %v2174_v48  ;;  %1317 = vmatpush.bf16.msra.mxu0 %v2111_v8 }
 0x979   :  { %v802_v60 = vpop.f32.mrf.mxu3  ;;  %v891_v61 = vpop.f32.mrf.mxu2 }
 0x97a   :  { %v2323_v62 = vadd.f32 %v802_v60, %v639_v39  ;;  %v915_v63 = vadd.f32 %v891_v61, %v2202_v0 }
 0x97c   :  { %917 = vrot.lane.b32.xlu0 %v915_v63, %s2015_s22  ;;  %v1839_v63 = vld [vmem:[#allocation4 + $0x38] sm:$0xff] }
 0x97d   :  { %966 = vmatpush.bf16.msrb.mxu3 %v1839_v63 }
 0x981   :  { %v804_v1 = vpop.f32.mrf.mxu3  ;;  %v893_v2 = vpop.f32.mrf.mxu2 }
 0x982   :  { %v1838_v1 = vld [vmem:[#allocation4 + $0x30] sm:$0xff] }
 0x983   :  { %967 = vmatpush.bf16.msrb.mxu3 %v1838_v1 }
 0x9aa   :  { %v878_v3 = vpop.f32.mrf.mxu1  ;;  %v985_v4 = vpop.f32.mrf.mxu0 }
 0x9ab   :  { %v1009_v6 = vadd.f32 %v985_v4, %v2131_v18  ;;  %v879_v30 = vadd.f32 %v2213_v13, %v878_v3  ;;  %v989_v25 = vadd.f32 %v985_v4, %v975_v54 }
 0x9ad   :  { %1011 = vrot.lane.b32.xlu1 %v1009_v6, %s2015_s22  ;;  %v895_v21 = vadd.f32 %v891_v61, %v879_v30  ;;  %v1769_v29 = vmul.f32 -1.442695, %v989_v25 }
 0x9af   :  { %v1758_v9 = vmul.f32 -1.442695, %v895_v21 }
 0x9b1   :  { %1901 = vpow2.f32 %v1758_v9 }
 0x9b2   :  { %v880_v8 = vpop.f32.mrf.mxu1  ;;  %v987_v5 = vpop.f32.mrf.mxu0 }
 0x9b7   :  { %v1902_v10 = vpop.eup %1901 }
 0x9b8   :  { %v899_v12 = vadd.f32 1.0, %v1902_v10 }
 0x9ba   :  { %1903 = vrcp.f32 %v899_v12  ;;  %v911_v20 = vand.u32 2147483648, %v899_v12  ;;  %vm905_vm2 = vweird.f32 %v899_v12  ;;  %v909_v22 = vand.u32 2147483647, %v899_v12 }
 0x9bb   :  { %1905 = vpow2.f32 %v1769_v29 }
 0x9bc   :  { %v912_v24 = vor.u32 1.1754944e-38, %v911_v20  ;;  %vm910_vm4 = vcmp.eq.f32.partialorder %v909_v22, 8.507059e+37 }
 0x9c0   :  { %v1904_v14 = vpop.eup %1903 }
 0x9c1   :  { %v901_v15 = vmul.f32 %v1904_v14, %v899_v12  ;;  %vm906_vm1 = vweird.f32 %v1904_v14  ;;  %v1906_v31 = vpop.eup %1905 }
 0x9c2   :  { %vm907_vm3 = vmor %vm905_vm2, %vm906_vm1  ;;  %v993_v32 = vadd.f32 1.0, %v1906_v31 }
 0x9c3   :  { %v902_v16 = vsub.f32 1.0, %v901_v15 }
 0x9c4   :  { %1907 = vrcp.f32 %v993_v32  ;;  %v1005_v38 = vand.u32 2147483648, %v993_v32  ;;  %vm999_vm6 = vweird.f32 %v993_v32  ;;  %v1003_v7 = vand.u32 2147483647, %v993_v32 }
 0x9c5   :  { %v903_v17 = vmul.f32 %v1904_v14, %v902_v16 }
 0x9c6   :  { %v1006_v42 = vor.u32 1.1754944e-38, %v1005_v38  ;;  %vm1004_vm9 = vcmp.eq.f32.partialorder %v1003_v7, 8.507059e+37 }
 0x9c7   :  { %v904_v19 = vadd.f32 %v1904_v14, %v903_v17 }
 0x9c9   :  { %v908_v23 = vsel %vm907_vm3, %v1904_v14, %v904_v19 }
 0x9ca   :  { %v913_v26 = vsel %vm910_vm4, %v912_v24, %v908_v23  ;;  %v1908_v33 = vpop.eup %1907 }
 0x9cb   :  { %v995_v34 = vmul.f32 %v1908_v33, %v993_v32  ;;  %vm1000_vm5 = vweird.f32 %v1908_v33  ;;  %v927_v11 = vsub.f32 1.0, %v913_v26  ;;  %v933_v59 = vmul.f32 %v913_v26, %v2300_v46 }
 0x9cc   :  { %vm1001_vm8 = vmor %vm999_vm6, %vm1000_vm5 }
 0x9cd   :  { %v996_v35 = vsub.f32 1.0, %v995_v34 }
 0x9cf   :  { %v997_v36 = vmul.f32 %v1908_v33, %v996_v35  ;;  %v1142_v35 = vld [vmem:[#allocation2 + $0x28] sm:$0xff] }
 0x9d1   :  { %v998_v37 = vadd.f32 %v1908_v33, %v997_v36 }
 0x9d3   :  { %v1002_v41 = vsel %vm1001_vm8, %v1908_v33, %v998_v37 }
 0x9d4   :  { %v1007_v44 = vsel %vm1004_vm9, %v1006_v42, %v1002_v41 }
 0x9d5   :  { %v1021_v2 = vsub.f32 1.0, %v1007_v44  ;;  %v1027_v4 = vmul.f32 %v1007_v44, %v2306_v57  ;;  %v1955_v57 = vld [vmem:[%s2474_s3 + $0x8] sm:$0xff] }
 0x9ee   :  { %v918_v27 = vpop.permute.xlu0 %917 }
 0x9ef   :  { %v920_v28 = vmul.f32 %v918_v27, %v913_v26 }
 0x9f1   :  { %922 = vrot.lane.b32.xlu2 %v920_v28, %s2015_s22 }
 0xa1f   :  { %v1012_v43 = vpop.permute.xlu1 %1011 }
 0xa20   :  { %v1014_v49 = vmul.f32 %v1012_v43, %v1007_v44 }
 0xa22   :  { %1016 = vrot.lane.b32.xlu0 %v1014_v49, %s2015_s22 }
 0xa4b   :  { %v923_v50 = vpop.permute.xlu2 %922 }
 0xa4c   :  { %v925_v51 = vadd.f32 %v923_v50, %v879_v30 }
 0xa4e   :  { %1909 = vtanh.f32 %v925_v51 }
 0xa54   :  { %v1910_v52 = vpop.eup %1909 }
 0xa55   :  { %929 = vrot.lane.b32.xlu1 %v1910_v52, %s2018_s26 }
 0xa94   :  { %v1017_v53 = vpop.permute.xlu0 %1016 }
 0xa95   :  { %v1019_v55 = vadd.f32 %v1017_v53, %v975_v54 }
 0xa97   :  { %1911 = vtanh.f32 %v1019_v55 }
 0xa9d   :  { %v1912_v56 = vpop.eup %1911 }
 0xa9e   :  { %1023 = vrot.lane.b32.xlu2 %v1912_v56, %s2018_s26 }
 0xac7   :  { %v930_v58 = vpop.permute.xlu1 %929 }
 0xac8   :  { %v932_v39 = vmul.f32 %v930_v58, %v927_v11 }
 0xaca   :  { %v2335_v60 = vadd.f32 %v933_v59, %v932_v39 }
 0xacc   :  { %v936_v61 = vpack.c.bf16 %v2335_v60, %v2335_v60 }
 0xace   :  { %943 = vrot.lane.b32.xlu0 %v936_v61, %s2018_s26 }
 0xaf8   :  { %v1024_v3 = vpop.permute.xlu2 %1023 }
 0xaf9   :  { %v1026_v6 = vmul.f32 %v1024_v3, %v1021_v2 }
 0xafb   :  { %v2341_v8 = vadd.f32 %v1027_v4, %v1026_v6 }
 0xafd   :  { %v1029_v46 = vpack.c.bf16 %v2341_v8, %v2341_v8 }
 0xaff   :  { %1031 = vrot.lane.b32.xlu1 %v1029_v46, %s2018_s26 }
 0xb40   :  { %v944_v5 = vpop.permute.xlu0 %943 }
 0xb41   :  { %1767 = vmatmul.msk.bf16.vlgmr.msrb.gmra.mxu3 %vm268_vm7, %v944_v5  ;;  %1771 = vmatmul.msk.bf16.vlgmr.msra.gmra.mxu2 %vm268_vm7, %v944_v5 }
 0xb42   :  { %1389 = vmatpush.bf16.msra.mxu2 %v2142_v40  ;;  %v1956_v40 = vld [vmem:[%s2474_s3] sm:$0xff] }
 0xb46   :  { %1390 = vmatpush.bf16.msra.mxu2 %v2154_v45 }
 0xb71   :  { %v1032_v30 = vpop.permute.xlu1 %1031 }
 0xb72   :  { %1770 = vmatmul.msk.bf16.vlgmr.msra.gmra.mxu1 %vm268_vm7, %v1032_v30  ;;  %1782 = vmatmul.msk.bf16.vlgmr.msrb.gmra.mxu0 %vm268_vm7, %v1032_v30  ;;  %v1841_v30 = vld [vmem:[#allocation4 + $0x48] sm:$0xff] }
 0xb73   :  { %1376 = vmatpush.bf16.msra.mxu1 %v2167_v47  ;;  %1483 = vmatpush.bf16.msrb.mxu0 %v1955_v57  ;;  %v1840_v57 = vld [vmem:[#allocation4 + $0x40] sm:$0xff] }
 0xb74   :  { %1133 = vmatpush.bf16.msra.mxu3 %v1841_v30 }
 0xb77   :  { %1377 = vmatpush.bf16.msra.mxu1 %v2174_v48  ;;  %1484 = vmatpush.bf16.msrb.mxu0 %v1956_v40 }
 0xb78   :  { %1134 = vmatpush.bf16.msra.mxu3 %v1840_v57 }
 0xbc4   :  { %v969_v45 = vpop.f32.mrf.mxu3  ;;  %v1058_v21 = vpop.f32.mrf.mxu2 }
 0xbc5   :  { %v2361_v9 = vadd.f32 %v969_v45, %v2323_v62  ;;  %v1082_v10 = vadd.f32 %v1058_v21, %v2202_v0 }
 0xbc7   :  { %1084 = vrot.lane.b32.xlu2 %v1082_v10, %s2015_s22 }
 0xbcc   :  { %v971_v47 = vpop.f32.mrf.mxu3  ;;  %v1060_v12 = vpop.f32.mrf.mxu2 }
 0xbef   :  { %v1045_v14 = vpop.f32.mrf.mxu1  ;;  %v1152_v15 = vpop.f32.mrf.mxu0 }
 0xbf0   :  { %v1046_v48 = vadd.f32 %v2213_v13, %v1045_v14  ;;  %v1176_v16 = vadd.f32 %v1152_v15, %v2131_v18  ;;  %v1156_v36 = vadd.f32 %v1152_v15, %v1142_v35  ;;  %v1957_v14 = vld [vmem:[%s2478_s7 + $0x8] sm:$0xff] }
 0xbf2   :  { %v1062_v17 = vadd.f32 %v1058_v21, %v1046_v48  ;;  %1178 = vrot.lane.b32.xlu0 %v1176_v16, %s2015_s22  ;;  %v1783_v37 = vmul.f32 -1.442695, %v1156_v36  ;;  %v1960_v16 = vld [vmem:[%s2476_s5] sm:$0xff]  ;;  %v1309_v36 = vld [vmem:[#allocation2 + $0x30] sm:$0xff] }
 0xbf4   :  { %v1772_v19 = vmul.f32 -1.442695, %v1062_v17 }
 0xbf6   :  { %1913 = vpow2.f32 %v1772_v19 }
 0xbf7   :  { %v1047_v20 = vpop.f32.mrf.mxu1  ;;  %v1154_v22 = vpop.f32.mrf.mxu0 }
 0xbfc   :  { %v1914_v62 = vpop.eup %1913 }
 0xbfd   :  { %v1066_v23 = vadd.f32 1.0, %v1914_v62 }
 0xbff   :  { %1915 = vrcp.f32 %v1066_v23  ;;  %v1078_v28 = vand.u32 2147483648, %v1066_v23  ;;  %vm1072_vm11 = vweird.f32 %v1066_v23  ;;  %v1076_v13 = vand.u32 2147483647, %v1066_v23 }
 0xc00   :  { %1917 = vpow2.f32 %v1783_v37 }
 0xc01   :  { %v1079_v31 = vor.u32 1.1754944e-38, %v1078_v28  ;;  %vm1077_vm13 = vcmp.eq.f32.partialorder %v1076_v13, 8.507059e+37 }
 0xc05   :  { %v1916_v24 = vpop.eup %1915 }
 0xc06   :  { %v1068_v54 = vmul.f32 %v1916_v24, %v1066_v23  ;;  %vm1073_vm10 = vweird.f32 %v1916_v24  ;;  %v1918_v38 = vpop.eup %1917 }
 0xc07   :  { %vm1074_vm12 = vmor %vm1072_vm11, %vm1073_vm10  ;;  %v1160_v7 = vadd.f32 1.0, %v1918_v38 }
 0xc08   :  { %v1069_v25 = vsub.f32 1.0, %v1068_v54 }
 0xc09   :  { %1919 = vrcp.f32 %v1160_v7  ;;  %v1172_v50 = vand.u32 2147483648, %v1160_v7  ;;  %vm1166_vm15 = vweird.f32 %v1160_v7  ;;  %v1170_v51 = vand.u32 2147483647, %v1160_v7 }
 0xc0a   :  { %v1070_v26 = vmul.f32 %v1916_v24, %v1069_v25 }
 0xc0b   :  { %v1173_v53 = vor.u32 1.1754944e-38, %v1172_v50  ;;  %vm1171_vm1 = vcmp.eq.f32.partialorder %v1170_v51, 8.507059e+37 }
 0xc0c   :  { %v1071_v27 = vadd.f32 %v1916_v24, %v1070_v26  ;;  %v2409_v26 = vld [vmem:[%s2477_s6] ss:$0 sm:$0xff] }
 0xc0e   :  { %v1075_v29 = vsel %vm1074_vm12, %v1916_v24, %v1071_v27 }
 0xc0f   :  { %v1080_v33 = vsel %vm1077_vm13, %v1079_v31, %v1075_v29  ;;  %v1920_v41 = vpop.eup %1919 }
 0xc10   :  { %v1162_v42 = vmul.f32 %v1920_v41, %v1160_v7  ;;  %vm1167_vm14 = vweird.f32 %v1920_v41  ;;  %v1094_v2 = vsub.f32 1.0, %v1080_v33  ;;  %v1100_v4 = vmul.f32 %v1080_v33, %v2335_v60 }
 0xc11   :  { %vm1168_vm0 = vmor %vm1166_vm15, %vm1167_vm14 }
 0xc12   :  { %v1163_v43 = vsub.f32 1.0, %v1162_v42 }
 0xc14   :  { %v1164_v44 = vmul.f32 %v1920_v41, %v1163_v43 }
 0xc16   :  { %v1165_v49 = vadd.f32 %v1920_v41, %v1164_v44 }
 0xc18   :  { %v1169_v52 = vsel %vm1168_vm0, %v1920_v41, %v1165_v49 }
 0xc19   :  { %v1174_v55 = vsel %vm1171_vm1, %v1173_v53, %v1169_v52 }
 0xc1a   :  { %v1188_v40 = vsub.f32 1.0, %v1174_v55  ;;  %v1194_v21 = vmul.f32 %v1174_v55, %v2341_v8  ;;  %v1958_v8 = vld [vmem:[%s2478_s7] sm:$0xff] }
 0xc21   :  { %v1085_v32 = vpop.permute.xlu2 %1084 }
 0xc22   :  { %v1087_v34 = vmul.f32 %v1085_v32, %v1080_v33 }
 0xc24   :  { %1089 = vrot.lane.b32.xlu1 %v1087_v34, %s2015_s22 }
 0xc64   :  { %v1179_v56 = vpop.permute.xlu0 %1178 }
 0xc65   :  { %v1181_v11 = vmul.f32 %v1179_v56, %v1174_v55 }
 0xc67   :  { %1183 = vrot.lane.b32.xlu2 %v1181_v11, %s2015_s22 }
 0xc96   :  { %v1090_v58 = vpop.permute.xlu1 %1089 }
 0xc97   :  { %v1092_v59 = vadd.f32 %v1090_v58, %v1046_v48  ;;  %v1959_v48 = vld [vmem:[%s2476_s5 + $0x8] sm:$0xff] }
 0xc99   :  { %1921 = vtanh.f32 %v1092_v59 }
 0xc9f   :  { %v1922_v39 = vpop.eup %1921 }
 0xca0   :  { %1096 = vrot.lane.b32.xlu0 %v1922_v39, %s2018_s26 }
 0xcc1   :  { %v1184_v61 = vpop.permute.xlu2 %1183 }
 0xcc2   :  { %v1186_v63 = vadd.f32 %v1184_v61, %v1142_v35 }
 0xcc4   :  { %1923 = vtanh.f32 %v1186_v63 }
 0xcca   :  { %v1924_v1 = vpop.eup %1923 }
 0xccb   :  { %1190 = vrot.lane.b32.xlu1 %v1924_v1, %s2018_s26 }
 0xd12   :  { %v1097_v3 = vpop.permute.xlu0 %1096 }
 0xd13   :  { %v1099_v6 = vmul.f32 %v1097_v3, %v1094_v2 }
 0xd15   :  { %v2373_v46 = vadd.f32 %v1100_v4, %v1099_v6 }
 0xd17   :  { %v1103_v5 = vpack.c.bf16 %v2373_v46, %v2373_v46 }
 0xd19   :  { %1110 = vrot.lane.b32.xlu2 %v1103_v5, %s2018_s26 }
 0xd3d   :  { %v1191_v45 = vpop.permute.xlu1 %1190 }
 0xd3e   :  { %v1193_v10 = vmul.f32 %v1191_v45, %v1188_v40 }
 0xd40   :  { %v2379_v47 = vadd.f32 %v1194_v21, %v1193_v10 }
 0xd42   :  { %v1196_v60 = vpack.c.bf16 %v2379_v47, %v2379_v47 }
 0xd44   :  { %1198 = vrot.lane.b32.xlu0 %v1196_v60, %s2018_s26 }
 0xd73   :  { %v1111_v12 = vpop.permute.xlu2 %1110 }
 0xd74   :  { %1781 = vmatmul.msk.bf16.vlgmr.msra.gmra.mxu3 %vm268_vm7, %v1111_v12  ;;  %1785 = vmatmul.msk.bf16.vlgmr.msrb.gmra.mxu2 %vm268_vm7, %v1111_v12 }
 0xd75   :  { %1556 = vmatpush.bf16.msrb.mxu2 %v1957_v14 }
 0xd79   :  { %1557 = vmatpush.bf16.msrb.mxu2 %v1958_v8 }
 0xdb6   :  { %v1199_v15 = vpop.permute.xlu0 %1198 }
 0xdb7   :  { %1784 = vmatmul.msk.bf16.vlgmr.msrb.gmra.mxu1 %vm268_vm7, %v1199_v15  ;;  %1796 = vmatmul.msk.bf16.vlgmr.msra.gmra.mxu0 %vm268_vm7, %v1199_v15 }
 0xdb8   :  { %1543 = vmatpush.bf16.msrb.mxu1 %v1959_v48  ;;  %v1843_v48 = vld [vmem:[#allocation4 + $0x58] sm:$0xff] }
 0xdb9   :  { %1300 = vmatpush.bf16.msrb.mxu3 %v1843_v48 }
 0xdbc   :  { %1544 = vmatpush.bf16.msrb.mxu1 %v1960_v16  ;;  %v1842_v16 = vld [vmem:[#allocation4 + $0x50] sm:$0xff] }
 0xdbd   :  { %1301 = vmatpush.bf16.msrb.mxu3 %v1842_v16 }
 0xdf7   :  { %v1136_v17 = vpop.f32.mrf.mxu3  ;;  %v1225_v19 = vpop.f32.mrf.mxu2 }
 0xdf8   :  { %v2401_v20 = vadd.f32 %v1136_v17, %v2361_v9  ;;  %v1249_v22 = vadd.f32 %v1225_v19, %v2202_v0 }
 0xdfa   :  { %1251 = vrot.lane.b32.xlu1 %v1249_v22, %s2015_s22 }
 0xdff   :  { %v1138_v62 = vpop.f32.mrf.mxu3  ;;  %v1227_v23 = vpop.f32.mrf.mxu2 }
 0xe34   :  { %v1212_v24 = vpop.f32.mrf.mxu1  ;;  %v1319_v54 = vpop.f32.mrf.mxu0 }
 0xe35   :  { %v1343_v25 = vadd.f32 %v1319_v54, %v2131_v18  ;;  %v1213_v27 = vadd.f32 %v2409_v26, %v1212_v24  ;;  %v1323_v37 = vadd.f32 %v1319_v54, %v1309_v36 }
 0xe37   :  { %1345 = vrot.lane.b32.xlu2 %v1343_v25, %s2015_s22  ;;  %v1229_v9 = vadd.f32 %v1225_v19, %v1213_v27  ;;  %v1797_v7 = vmul.f32 -1.442695, %v1323_v37 }
 0xe39   :  { %v1786_v29 = vmul.f32 -1.442695, %v1229_v9 }
 0xe3b   :  { %1925 = vpow2.f32 %v1786_v29 }
 0xe3c   :  { %v1214_v28 = vpop.f32.mrf.mxu1  ;;  %v1321_v13 = vpop.f32.mrf.mxu0 }
 0xe41   :  { %v1926_v31 = vpop.eup %1925 }
 0xe42   :  { %v1233_v32 = vadd.f32 1.0, %v1926_v31 }
 0xe44   :  { %1927 = vrcp.f32 %v1233_v32  ;;  %v1245_v42 = vand.u32 2147483648, %v1233_v32  ;;  %vm1239_vm3 = vweird.f32 %v1233_v32  ;;  %v1243_v43 = vand.u32 2147483647, %v1233_v32 }
 0xe45   :  { %1929 = vpow2.f32 %v1797_v7 }
 0xe46   :  { %v1246_v49 = vor.u32 1.1754944e-38, %v1245_v42  ;;  %vm1244_vm5 = vcmp.eq.f32.partialorder %v1243_v43, 8.507059e+37 }
 0xe4a   :  { %v1928_v33 = vpop.eup %1927 }
 0xe4b   :  { %v1235_v34 = vmul.f32 %v1928_v33, %v1233_v32  ;;  %vm1240_vm2 = vweird.f32 %v1928_v33  ;;  %v1930_v53 = vpop.eup %1929 }
 0xe4c   :  { %vm1241_vm4 = vmor %vm1239_vm3, %vm1240_vm2  ;;  %v1327_v55 = vadd.f32 1.0, %v1930_v53 }
 0xe4d   :  { %v1236_v35 = vsub.f32 1.0, %v1235_v34 }
 0xe4e   :  { %1931 = vrcp.f32 %v1327_v55  ;;  %v1339_v61 = vand.u32 2147483648, %v1327_v55  ;;  %vm1333_vm8 = vweird.f32 %v1327_v55  ;;  %v1337_v63 = vand.u32 2147483647, %v1327_v55 }
 0xe4f   :  { %v1237_v38 = vmul.f32 %v1928_v33, %v1236_v35 }
 0xe50   :  { %v1340_v2 = vor.u32 1.1754944e-38, %v1339_v61  ;;  %vm1338_vm10 = vcmp.eq.f32.partialorder %v1337_v63, 8.507059e+37 }
 0xe51   :  { %v1238_v41 = vadd.f32 %v1928_v33, %v1237_v38 }
 0xe53   :  { %v1242_v44 = vsel %vm1241_vm4, %v1928_v33, %v1238_v41  ;;  %v1476_v41 = vld [vmem:[#allocation2 + $0x38] sm:$0xff] }
 0xe54   :  { %v1247_v51 = vsel %vm1244_vm5, %v1246_v49, %v1242_v44  ;;  %v1932_v56 = vpop.eup %1931 }
 0xe55   :  { %v1329_v11 = vmul.f32 %v1932_v56, %v1327_v55  ;;  %vm1334_vm6 = vweird.f32 %v1932_v56  ;;  %v1261_v10 = vsub.f32 1.0, %v1247_v51  ;;  %v1267_v12 = vmul.f32 %v1247_v51, %v2373_v46 }
 0xe56   :  { %vm1335_vm9 = vmor %vm1333_vm8, %vm1334_vm6 }
 0xe57   :  { %v1330_v58 = vsub.f32 1.0, %v1329_v11 }
 0xe59   :  { %v1331_v59 = vmul.f32 %v1932_v56, %v1330_v58 }
 0xe5b   :  { %v1332_v39 = vadd.f32 %v1932_v56, %v1331_v59 }
 0xe5d   :  { %v1336_v1 = vsel %vm1335_vm9, %v1932_v56, %v1332_v39 }
 0xe5e   :  { %v1341_v4 = vsel %vm1338_vm10, %v1340_v2, %v1336_v1 }
 0xe5f   :  { %v1355_v17 = vsub.f32 1.0, %v1341_v4  ;;  %v1361_v22 = vmul.f32 %v1341_v4, %v2379_v47 }
 0xe6c   :  { %v1252_v50 = vpop.permute.xlu1 %1251 }
 0xe6d   :  { %v1254_v52 = vmul.f32 %v1252_v50, %v1247_v51 }
 0xe6f   :  { %1256 = vrot.lane.b32.xlu0 %v1254_v52, %s2015_s22 }
 0xe91   :  { %v1346_v3 = vpop.permute.xlu2 %1345 }
 0xe92   :  { %v1348_v6 = vmul.f32 %v1346_v3, %v1341_v4 }
 0xe94   :  { %1350 = vrot.lane.b32.xlu1 %v1348_v6, %s2015_s22 }
 0xee1   :  { %v1257_v5 = vpop.permute.xlu0 %1256 }
 0xee2   :  { %v1259_v30 = vadd.f32 %v1257_v5, %v1213_v27 }
 0xee4   :  { %1933 = vtanh.f32 %v1259_v30 }
 0xeea   :  { %v1934_v57 = vpop.eup %1933 }
 0xeeb   :  { %1263 = vrot.lane.b32.xlu2 %v1934_v57, %s2018_s26 }
 0xf06   :  { %v1351_v40 = vpop.permute.xlu1 %1350 }
 0xf07   :  { %v1353_v45 = vadd.f32 %v1351_v40, %v1309_v36 }
 0xf09   :  { %1935 = vtanh.f32 %v1353_v45 }
 0xf0f   :  { %v1936_v21 = vpop.eup %1935 }
 0xf10   :  { %1357 = vrot.lane.b32.xlu0 %v1936_v21, %s2018_s26 }
 0xf45   :  { %v1264_v60 = vpop.permute.xlu2 %1263 }
 0xf46   :  { %v1266_v14 = vmul.f32 %v1264_v60, %v1261_v10 }
 0xf48   :  { %v2418_v8 = vadd.f32 %v1267_v12, %v1266_v14 }
 0xf4a   :  { %v1270_v15 = vpack.c.bf16 %v2418_v8, %v2418_v8 }
 0xf4c   :  { %1277 = vrot.lane.b32.xlu1 %v1270_v15, %s2018_s26 }
 0xf82   :  { %v1358_v19 = vpop.permute.xlu0 %1357 }
 0xf83   :  { %v1360_v62 = vmul.f32 %v1358_v19, %v1355_v17 }
 0xf85   :  { %v2424_v23 = vadd.f32 %v1361_v22, %v1360_v62 }
 0xf87   :  { %v1363_v46 = vpack.c.bf16 %v2424_v23, %v2424_v23 }
 0xf89   :  { %1365 = vrot.lane.b32.xlu2 %v1363_v46, %s2018_s26  ;;  %v1845_v46 = vld [vmem:[#allocation4 + $0x68] sm:$0xff] }
 0xf8a   :  { %1467 = vmatpush.bf16.msra.mxu3 %v1845_v46 }
 0xfbe   :  { %v1278_v24 = vpop.permute.xlu1 %1277 }
 0xfbf   :  { %1795 = vmatmul.msk.bf16.vlgmr.msrb.gmra.mxu3 %vm268_vm7, %v1278_v24  ;;  %1799 = vmatmul.msk.bf16.vlgmr.msra.gmra.mxu2 %vm268_vm7, %v1278_v24  ;;  %v1844_v24 = vld [vmem:[#allocation4 + $0x60] sm:$0xff] }
 0xfc0   :  { %1468 = vmatpush.bf16.msra.mxu3 %v1844_v24 }
 0xfe3   :  { %v1366_v54 = vpop.permute.xlu2 %1365 }
 0xfe4   :  { %1798 = vmatmul.msk.bf16.vlgmr.msra.gmra.mxu1 %vm268_vm7, %v1366_v54  ;;  %1810 = vmatmul.msk.bf16.vlgmr.msrb.gmra.mxu0 %vm268_vm7, %v1366_v54 }
0x1042   :  { %v1303_v25 = vpop.f32.mrf.mxu3  ;;  %v1392_v47 = vpop.f32.mrf.mxu2 }
0x1043   :  { %v2434_v27 = vadd.f32 %v1303_v25, %v2401_v20  ;;  %v1416_v9 = vadd.f32 %v1392_v47, %v2202_v0 }
0x1045   :  { %1418 = vrot.lane.b32.xlu0 %v1416_v9, %s2015_s22 }
0x104a   :  { %v1305_v28 = vpop.f32.mrf.mxu3  ;;  %v1394_v13 = vpop.f32.mrf.mxu2 }
0x1061   :  { %v1379_v29 = vpop.f32.mrf.mxu1  ;;  %v1486_v31 = vpop.f32.mrf.mxu0 }
0x1062   :  { %v1510_v32 = vadd.f32 %v1486_v31, %v2131_v18  ;;  %v1380_v35 = vadd.f32 %v2409_v26, %v1379_v29  ;;  %v1490_v43 = vadd.f32 %v1486_v31, %v1476_v41 }
0x1064   :  { %1512 = vrot.lane.b32.xlu1 %v1510_v32, %s2015_s22  ;;  %v1396_v36 = vadd.f32 %v1392_v47, %v1380_v35  ;;  %v1811_v49 = vmul.f32 -1.442695, %v1490_v43 }
0x1066   :  { %v1800_v37 = vmul.f32 -1.442695, %v1396_v36 }
0x1068   :  { %1937 = vpow2.f32 %v1800_v37 }
0x1069   :  { %v1381_v33 = vpop.f32.mrf.mxu1  ;;  %v1488_v34 = vpop.f32.mrf.mxu0 }
0x106e   :  { %v1938_v20 = vpop.eup %1937 }
0x106f   :  { %v1400_v38 = vadd.f32 1.0, %v1938_v20 }
0x1071   :  { %1939 = vrcp.f32 %v1400_v38  ;;  %v1412_v51 = vand.u32 2147483648, %v1400_v38  ;;  %vm1406_vm12 = vweird.f32 %v1400_v38  ;;  %v1410_v52 = vand.u32 2147483647, %v1400_v38 }
0x1072   :  { %1941 = vpow2.f32 %v1811_v49 }
0x1073   :  { %v1413_v56 = vor.u32 1.1754944e-38, %v1412_v51  ;;  %vm1411_vm14 = vcmp.eq.f32.partialorder %v1410_v52, 8.507059e+37 }
0x1077   :  { %v1940_v7 = vpop.eup %1939 }
0x1078   :  { %v1402_v42 = vmul.f32 %v1940_v7, %v1400_v38  ;;  %vm1407_vm11 = vweird.f32 %v1940_v7  ;;  %v1942_v53 = vpop.eup %1941 }
0x1079   :  { %vm1408_vm13 = vmor %vm1406_vm12, %vm1407_vm11  ;;  %v1494_v11 = vadd.f32 1.0, %v1942_v53 }
0x107a   :  { %v1403_v44 = vsub.f32 1.0, %v1402_v42 }
0x107b   :  { %1943 = vrcp.f32 %v1494_v11  ;;  %v1506_v4 = vand.u32 2147483648, %v1494_v11  ;;  %vm1500_vm0 = vweird.f32 %v1494_v11  ;;  %v1504_v6 = vand.u32 2147483647, %v1494_v11 }
0x107c   :  { %v1404_v50 = vmul.f32 %v1940_v7, %v1403_v44 }
0x107d   :  { %v1507_v30 = vor.u32 1.1754944e-38, %v1506_v4  ;;  %vm1505_vm2 = vcmp.eq.f32.partialorder %v1504_v6, 8.507059e+37 }
0x107e   :  { %v1405_v18 = vadd.f32 %v1940_v7, %v1404_v50 }
0x1080   :  { %v1409_v55 = vsel %vm1408_vm13, %v1940_v7, %v1405_v18 }
0x1081   :  { %v1414_v58 = vsel %vm1411_vm14, %v1413_v56, %v1409_v55  ;;  %v1944_v61 = vpop.eup %1943 }
0x1082   :  { %v1496_v63 = vmul.f32 %v1944_v61, %v1494_v11  ;;  %vm1501_vm15 = vweird.f32 %v1944_v61  ;;  %v1428_v48 = vsub.f32 1.0, %v1414_v58  ;;  %v1434_v17 = vmul.f32 %v1414_v58, %v2418_v8 }
0x1083   :  { %vm1502_vm1 = vmor %vm1500_vm0, %vm1501_vm15 }
0x1084   :  { %v1497_v1 = vsub.f32 1.0, %v1496_v63 }
0x1086   :  { %v1498_v2 = vmul.f32 %v1944_v61, %v1497_v1 }
0x1088   :  { %v1499_v3 = vadd.f32 %v1944_v61, %v1498_v2 }
0x108a   :  { %v1503_v5 = vsel %vm1502_vm1, %v1944_v61, %v1499_v3 }
0x108b   :  { %v1508_v40 = vsel %vm1505_vm2, %v1507_v30, %v1503_v5  ;;  %v1858_v5 = vld [vmem:[%s2481_s10] ss:$0 sm:$0xff] }
0x108c   :  { %v1522_v54 = vsub.f32 1.0, %v1508_v40  ;;  %v1528_v47 = vmul.f32 %v1508_v40, %v2424_v23 }
0x10b7   :  { %v1419_v59 = vpop.permute.xlu0 %1418 }
0x10b8   :  { %v1421_v39 = vmul.f32 %v1419_v59, %v1414_v58  ;;  %v1847_v59 = vld [vmem:[#allocation4 + $0x78] sm:$0xff] }
0x10b9   :  { %1634 = vmatpush.bf16.msrb.mxu3 %v1847_v59 }
0x10ba   :  { %1423 = vrot.lane.b32.xlu2 %v1421_v39, %s2015_s22  ;;  %v1846_v39 = vld [vmem:[#allocation4 + $0x70] sm:$0xff] }
0x10bd   :  { %1635 = vmatpush.bf16.msrb.mxu3 %v1846_v39 }
0x10d6   :  { %v1513_v57 = vpop.permute.xlu1 %1512 }
0x10d7   :  { %v1515_v45 = vmul.f32 %v1513_v57, %v1508_v40 }
0x10d9   :  { %1517 = vrot.lane.b32.xlu0 %v1515_v45, %s2015_s22 }
0x1114   :  { %v1424_v21 = vpop.permute.xlu2 %1423 }
0x1115   :  { %v1426_v10 = vadd.f32 %v1424_v21, %v1380_v35 }
0x1117   :  { %1945 = vtanh.f32 %v1426_v10 }
0x111d   :  { %v1946_v60 = vpop.eup %1945 }
0x111e   :  { %1430 = vrot.lane.b32.xlu1 %v1946_v60, %s2018_s26 }
0x114b   :  { %v1518_v12 = vpop.permute.xlu0 %1517 }
0x114c   :  { %v1520_v14 = vadd.f32 %v1518_v12, %v1476_v41 }
0x114e   :  { %1947 = vtanh.f32 %v1520_v14 }
0x1154   :  { %v1948_v15 = vpop.eup %1947 }
0x1155   :  { %1524 = vrot.lane.b32.xlu2 %v1948_v15, %s2018_s26 }
0x1190   :  { %v1431_v16 = vpop.permute.xlu1 %1430 }
0x1191   :  { %v1433_v19 = vmul.f32 %v1431_v16, %v1428_v48 }
0x1193   :  { %v2446_v22 = vadd.f32 %v1434_v17, %v1433_v19 }
0x1195   :  { %v1437_v62 = vpack.c.bf16 %v2446_v22, %v2446_v22 }
0x1197   :  { %1444 = vrot.lane.b32.xlu0 %v1437_v62, %s2018_s26 }
0x11af   :  { %v1525_v25 = vpop.permute.xlu2 %1524 }
0x11b0   :  { %v1527_v9 = vmul.f32 %v1525_v25, %v1522_v54 }
0x11b2   :  { %v1529_v28 = vadd.f32 %v1528_v47, %v1527_v9 }
0x11b4   :  { %v1530_v13 = vpack.c.bf16 %v1529_v28, %v1529_v28 }
0x11b6   :  { %1532 = vrot.lane.b32.xlu1 %v1530_v13, %s2018_s26 }
0x1209   :  { %v1445_v8 = vpop.permute.xlu0 %1444 }
0x120a   :  { %1809 = vmatmul.msk.bf16.vlgmr.msra.gmra.mxu3 %vm268_vm7, %v1445_v8  ;;  %1813 = vmatmul.msk.bf16.vlgmr.msrb.gmra.mxu2 %vm268_vm7, %v1445_v8 }
0x1228   :  { %v1533_v29 = vpop.permute.xlu1 %1532 }
0x1229   :  { %1812 = vmatmul.msk.bf16.vlgmr.msrb.gmra.mxu1 %vm268_vm7, %v1533_v29 }
0x128d   :  { %v1470_v31 = vpop.f32.mrf.mxu3  ;;  %v1559_v32 = vpop.f32.mrf.mxu2 }
0x128e   :  { %v1474_v33 = vadd.f32 %v1470_v31, %v2434_v27  ;;  %v1583_v34 = vadd.f32 %v1559_v32, %v2202_v0 }
0x1290   :  { %1585 = vrot.lane.b32.xlu2 %v1583_v34, %s2015_s22 }
0x1295   :  { %v1472_v23 = vpop.f32.mrf.mxu3  ;;  %v1561_v35 = vpop.f32.mrf.mxu2 }
0x12a6   :  { %v1546_v36 = vpop.f32.mrf.mxu1 }
0x12a7   :  { %v1547_v20 = vadd.f32 %v2409_v26, %v1546_v36 }
0x12a9   :  { %v1563_v38 = vadd.f32 %v1559_v32, %v1547_v20 }
0x12ab   :  { %v1814_v7 = vmul.f32 -1.442695, %v1563_v38 }
0x12ad   :  { %1949 = vpow2.f32 %v1814_v7 }
0x12ae   :  { %v1548_v37 = vpop.f32.mrf.mxu1 }
0x12b3   :  { %v1950_v41 = vpop.eup %1949 }
0x12b4   :  { %v1567_v42 = vadd.f32 1.0, %v1950_v41 }
0x12b6   :  { %1951 = vrcp.f32 %v1567_v42  ;;  %v1579_v0 = vand.u32 2147483648, %v1567_v42  ;;  %vm1573_vm4 = vweird.f32 %v1567_v42  ;;  %v1577_v18 = vand.u32 2147483647, %v1567_v42 }
0x12b8   :  { %v1580_v52 = vor.u32 1.1754944e-38, %v1579_v0  ;;  %vm1578_vm6 = vcmp.eq.f32.partialorder %v1577_v18, 8.507059e+37 }
0x12bc   :  { %v1952_v43 = vpop.eup %1951 }
0x12bd   :  { %v1569_v44 = vmul.f32 %v1952_v43, %v1567_v42  ;;  %vm1574_vm3 = vweird.f32 %v1952_v43 }
0x12be   :  { %vm1575_vm5 = vmor %vm1573_vm4, %vm1574_vm3 }
0x12bf   :  { %v1570_v49 = vsub.f32 1.0, %v1569_v44 }
0x12c1   :  { %v1571_v27 = vmul.f32 %v1952_v43, %v1570_v49 }
0x12c3   :  { %v1572_v50 = vadd.f32 %v1952_v43, %v1571_v27 }
0x12c5   :  { %v1576_v51 = vsel %vm1575_vm5, %v1952_v43, %v1572_v50 }
0x12c6   :  { %v1581_v53 = vsel %vm1578_vm6, %v1580_v52, %v1576_v51 }
0x12c7   :  { %v1595_v61 = vsub.f32 1.0, %v1581_v53  ;;  %v1601_v1 = vmul.f32 %v1581_v53, %v2446_v22 }
0x12ea   :  { %v1586_v26 = vpop.permute.xlu2 %1585 }
0x12eb   :  { %v1588_v55 = vmul.f32 %v1586_v26, %v1581_v53 }
0x12ed   :  { %1590 = vrot.lane.b32.xlu0 %v1588_v55, %s2015_s22  ;;  %s2019_s22 = smov [#allocation7]  }
0x12ee   :  { %s1655_s1 = sshll.u32 %s2019_s22, 4  ;;  %s1656_s1 = int_to_ptr.vmem [resolvable:$true] %s1655_s1 }
0x135f   :  { %v1591_v56 = vpop.permute.xlu0 %1590 }
0x1360   :  { %v1593_v11 = vadd.f32 %v1591_v56, %v1547_v20 }
0x1362   :  { %1953 = vtanh.f32 %v1593_v11 }
0x1368   :  { %v1954_v58 = vpop.eup %1953 }
0x1369   :  { %1597 = vrot.lane.b32.xlu1 %v1954_v58, %s2018_s26 }
0x13db   :  { %v1598_v63 = vpop.permute.xlu1 %1597 }
0x13dc   :  { %v1600_v2 = vmul.f32 %v1598_v63, %v1595_v61 }
0x13de   :  { %v1602_v3 = vadd.f32 %v1601_v1, %v1600_v2 }
0x13e0   :  { %v1604_v4 = vpack.c.bf16 %v1602_v3, %v1602_v3 }
0x13e2   :  { %1611 = vrot.lane.b32.xlu2 %v1604_v4, %s2018_s26 }
0x143c   :  { %v1612_v6 = vpop.permute.xlu2 %1611 }
0x143d   :  { %1823 = vmatmul.msk.bf16.vlgmr.msrb.gmra.mxu3 %vm268_vm7, %v1612_v6 }
0x14c0   :  { %v1637_v30 = vpop.f32.mrf.mxu3 }
0x14c1   :  { %v1641_v57 = vadd.f32 %v1637_v30, %v1474_v33 }
0x14c3   :  { %v1648_v40 = vadd.f32 %v1858_v5, %v1641_v57 }
0x14c5   :  { %1649 = vst [vmem:[#allocation7] sm:$0xff] %v1648_v40 }
0x14c6   :  { %1660 = dma.vmem_to_hbm [thread:$0]  %s1656_s1, 128, %s1658_s16, [#allocation6]  }
0x14c8   :  { %v1639_v45 = vpop.f32.mrf.mxu3 }
0x14c9   :  { %2012 = dma.done.wait [#allocation6], 128  }
0x14ca   :  { %2013 = vsyncadd [#allocation6], 4294967168 }
0x14cb   :  { %1665 = vsyncpa [#allocation5], 1 }
0x14cc   :  { %1666 = vsyncpa [#allocation6], 1 }

</bundles_post_ra>
